<compile_context>
chip_gen: v6e
topology: v6e:2x2x1
jax: 0.10.0
libtpu: 0.0.40
codegen_flags: <defaults>
</compile_context>

<pallas_src>
import functools

import jax
import jax.numpy as jnp
from jax import lax
from jax.experimental import pallas as pl
from jax.experimental.pallas import tpu as pltpu

LRELU_SLOPE = 0.2
BN_EPS = 1e-5

_VMEM = pl.BlockSpec(memory_space=pltpu.MemorySpace.VMEM)


def _ce(flops, bytes_accessed, transcendentals=0):
    return pl.CostEstimate(flops=int(flops), transcendentals=int(transcendentals),
                           bytes_accessed=int(bytes_accessed))


# --------------------------- Pallas kernels ---------------------------------

def _conv_bias_lrelu_cm_kernel(w_ref, a_ref, b_ref, o_ref):
    """(Cout, K) @ (K, M) on the MXU (bf16 in / f32 acc) + bias + LeakyReLU.

    Lane dim of the output is M (lane-dense); epilogue in f32, store bf16."""
    y = jnp.dot(w_ref[...], a_ref[...], preferred_element_type=jnp.float32)
    y = y + b_ref[...]
    o_ref[...] = jnp.where(y > 0.0, y, LRELU_SLOPE * y).astype(o_ref.dtype)


def _conv_bn_lrelu_cm_kernel(w_ref, a_ref, g_ref, be_ref, o_ref):
    """(Cout, K)@(K, M) + training-mode BatchNorm (batch stats over M, i.e. the
    lane axis) + LeakyReLU.  Centered two-pass variance, all epilogue in f32."""
    y = jnp.dot(w_ref[...], a_ref[...], preferred_element_type=jnp.float32)
    mean = jnp.mean(y, axis=1, keepdims=True)                        # (C, 1)
    var = jnp.mean(jnp.square(y - mean), axis=1, keepdims=True)
    scale = g_ref[...] * lax.rsqrt(var + BN_EPS)
    z = (y - mean) * scale + be_ref[...]
    o_ref[...] = jnp.where(z > 0.0, z, LRELU_SLOPE * z).astype(o_ref.dtype)


def _conv_bn_lrelu_mc_kernel(a_ref, w_ref, g_ref, be_ref, o_ref):
    """(M, K)@(K, Cout) + BatchNorm (batch stats over the row axis) + LeakyReLU."""
    y = jnp.dot(a_ref[...], w_ref[...], preferred_element_type=jnp.float32)
    mean = jnp.mean(y, axis=0, keepdims=True)                        # (1, C)
    var = jnp.mean(jnp.square(y - mean), axis=0, keepdims=True)
    scale = g_ref[...] * lax.rsqrt(var + BN_EPS)
    z = (y - mean) * scale + be_ref[...]
    o_ref[...] = jnp.where(z > 0.0, z, LRELU_SLOPE * z).astype(o_ref.dtype)


def _conv_bn_lrelu_sigmoid_head_kernel(a_ref, w4_ref, g_ref, be_ref, w5_ref,
                                       b5_ref, o_ref, *, n_batch, hw, n_pos):
    """Layer 4 (conv+BN+LeakyReLU) fused with layer 5 (4x4 conv, Cout=1, sigmoid).

    Layer 5 is evaluated directly on the VMEM-resident layer-4 activation with a
    pre-scattered weight w5_ref of shape (hw, n_pos, C4): per image it is hw
    broadcast-FMAs + one lane reduction (VPU + XLU only), so no (8, 2048) patch
    matrix, no extra launch, no 1-lane masked MXU matmul."""
    # ---- layer 4 ----
    y = jnp.dot(a_ref[...], w4_ref[...], preferred_element_type=jnp.float32)
    mean = jnp.mean(y, axis=0, keepdims=True)
    var = jnp.mean(jnp.square(y - mean), axis=0, keepdims=True)
    scale = g_ref[...] * lax.rsqrt(var + BN_EPS)
    z = (y - mean) * scale + be_ref[...]
    y4 = jnp.where(z > 0.0, z, LRELU_SLOPE * z)          # (M4, C4) f32, stays in VMEM

    # ---- layer 5 folded in ----
    c4 = y4.shape[1]
    for n in range(n_batch):
        acc = jnp.zeros((n_pos, c4), jnp.float32)
        for r in range(hw):
            acc = acc + w5_ref[r] * y4[n * hw + r:n * hw + r + 1, :]
        logits = jnp.sum(acc, axis=1, keepdims=True) + b5_ref[...]   # (n_pos, 1)
        e = jnp.exp(-jnp.abs(logits))                                # stable sigmoid
        o_ref[n * n_pos:(n + 1) * n_pos, :] = jnp.where(
            logits >= 0.0, 1.0 / (1.0 + e), e / (1.0 + e))


# --------------------------- Pallas wrappers ---------------------------------

def _conv_bias_lrelu_cm(w_cm, a_km, bias_c1):
    C, K = w_cm.shape
    M = a_km.shape[1]
    return pl.pallas_call(
        _conv_bias_lrelu_cm_kernel,
        out_shape=jax.ShapeDtypeStruct((C, M), jnp.bfloat16),
        in_specs=[_VMEM, _VMEM, _VMEM],
        out_specs=_VMEM,
        cost_estimate=_ce(2 * C * K * M + 2 * C * M,
                          2 * (C * K + K * M + C * M) + 4 * C),
    )(w_cm, a_km, bias_c1)


def _conv_bn_lrelu_cm(w_cm, a_km, gamma_c1, beta_c1):
    C, K = w_cm.shape
    M = a_km.shape[1]
    return pl.pallas_call(
        _conv_bn_lrelu_cm_kernel,
        out_shape=jax.ShapeDtypeStruct((C, M), jnp.bfloat16),
        in_specs=[_VMEM] * 4,
        out_specs=_VMEM,
        cost_estimate=_ce(2 * C * K * M + 8 * C * M,
                          2 * (C * K + K * M + C * M) + 8 * C),
    )(w_cm, a_km, gamma_c1, beta_c1)


def _conv_bn_lrelu_mc(a_mk, w_kc, gamma_1c, beta_1c):
    M, K = a_mk.shape
    C = w_kc.shape[1]
    return pl.pallas_call(
        _conv_bn_lrelu_mc_kernel,
        out_shape=jax.ShapeDtypeStruct((M, C), jnp.bfloat16),
        in_specs=[_VMEM] * 4,
        out_specs=_VMEM,
        cost_estimate=_ce(2 * M * K * C + 8 * M * C,
                          2 * (M * K + K * C + M * C) + 8 * C),
    )(a_mk, w_kc, gamma_1c, beta_1c)


def _conv_bn_lrelu_head(a_mk, w4_kc, gamma_1c, beta_1c, w5_eff, b5,
                        *, n_batch, hw, n_pos):
    M, K = a_mk.shape
    C = w4_kc.shape[1]
    kernel = functools.partial(_conv_bn_lrelu_sigmoid_head_kernel,
                               n_batch=n_batch, hw=hw, n_pos=n_pos)
    return pl.pallas_call(
        kernel,
        out_shape=jax.ShapeDtypeStruct((n_batch * n_pos, 1), jnp.float32),
        in_specs=[_VMEM] * 6,
        out_specs=_VMEM,
        cost_estimate=_ce(2 * M * K * C + 8 * M * C + 3 * n_batch * hw * n_pos * C,
                          2 * (M * K + K * C) + 4 * (hw * n_pos * C + 2 * C)
                          + 4 * n_batch * n_pos,
                          transcendentals=n_batch * n_pos),
    )(a_mk, w4_kc, gamma_1c, beta_1c, w5_eff, b5)


# --------------------------- conv glue (XLA side) ----------------------------

# TODO(synk): the strided 4x4 im2col window gather stays in XLA — single-call
# whole-network fusion would need in-kernel stride-2 spatial gathers (strided /
# lane-restructuring slices) that Mosaic does not lower reliably, so per-layer
# fusion + tiny XLA gather fusions is the robust choice at these sizes.
def _patches(x_nhwc, k, stride, pad=1):
    N, H, W, C = x_nhwc.shape
    xp = jnp.pad(x_nhwc, ((0, 0), (pad, pad), (pad, pad), (0, 0)))
    Ho = (H + 2 * pad - k) // stride + 1
    Wo = (W + 2 * pad - k) // stride + 1
    cols = [xp[:, kh:kh + stride * Ho:stride, kw:kw + stride * Wo:stride, :]
            for kh in range(k) for kw in range(k)]
    return jnp.stack(cols, axis=3), (N, Ho, Wo)          # (N, Ho, Wo, k*k, C)


def _patches_mk(x_nhwc, k, stride):
    """im2col, (M, K) layout with K ordered (kh, kw, c)."""
    p, (N, Ho, Wo) = _patches(x_nhwc, k, stride)
    return p.reshape(N * Ho * Wo, k * k * x_nhwc.shape[-1]), (N, Ho, Wo)


def _patches_km(x_nhwc, k, stride):
    """im2col, transposed (K, M) layout (lane-dense M for the flipped matmul)."""
    p, (N, Ho, Wo) = _patches(x_nhwc, k, stride)
    K = k * k * x_nhwc.shape[-1]
    return (jnp.transpose(p, (3, 4, 0, 1, 2)).reshape(K, N * Ho * Wo),
            (N, Ho, Wo))


def _w_cm(w_oihw):
    """PyTorch (Cout, Cin, kh, kw) -> (Cout, kh*kw*Cin) bf16 (flipped layers)."""
    co, ci, kh, kw = w_oihw.shape
    return (jnp.transpose(w_oihw, (0, 2, 3, 1))
            .reshape(co, kh * kw * ci).astype(jnp.bfloat16))


def _w_kc(w_oihw):
    """PyTorch (Cout, Cin, kh, kw) -> (kh*kw*Cin, Cout) bf16."""
    co, ci, kh, kw = w_oihw.shape
    return (jnp.transpose(w_oihw, (2, 3, 1, 0))
            .reshape(kh * kw * ci, co).astype(jnp.bfloat16))


def _w5_effective(w5_oihw, hs, ws):
    """Fold the final 4x4 / stride-1 / pad-1 / Cout=1 conv over an (hs, ws)
    input into per-spatial-position weights: (hs*ws, n_pos, Cin) f32."""
    co, ci, kh, kw = w5_oihw.shape
    po, qo = hs - 1, ws - 1                    # output extent for k=4, s=1, p=1
    rows = []
    for h in range(hs):
        for w in range(ws):
            taps = []
            for pq in range(po * qo):
                p, q = divmod(pq, qo)
                ih, iw = h + 1 - p, w + 1 - q
                if 0 <= ih < kh and 0 <= iw < kw:
                    taps.append(w5_oihw[0, :, ih, iw])
                else:
                    taps.append(jnp.zeros((ci,), jnp.float32))
            rows.append(jnp.stack(taps, axis=0))          # (n_pos, Cin)
    return jnp.stack(rows, axis=0).astype(jnp.float32)    # (hs*ws, n_pos, Cin)


# --------------------------- full discriminator ------------------------------

def nlayer_discriminator_forward(x_nchw, p):
    x = jnp.transpose(x_nchw, (0, 2, 3, 1)).astype(jnp.bfloat16)     # NHWC bf16

    # layer 1: Conv(4x4, s2, bias) + LeakyReLU(0.2)   -- lane-dense (C, M)
    a, (N, Ho, Wo) = _patches_km(x, 4, 2)
    y = _conv_bias_lrelu_cm(_w_cm(p["w1"]), a, p["b1"].reshape(-1, 1))
    x = jnp.transpose(y.reshape(-1, N, Ho, Wo), (1, 2, 3, 0))         # NHWC bf16

    # layer 2: Conv(s2, no bias) + BatchNorm(batch stats) + LeakyReLU -- (C, M)
    a, (N, Ho, Wo) = _patches_km(x, 4, 2)
    y = _conv_bn_lrelu_cm(_w_cm(p["w2"]), a,
                          p["g2"].reshape(-1, 1), p["be2"].reshape(-1, 1))
    x = jnp.transpose(y.reshape(-1, N, Ho, Wo), (1, 2, 3, 0))

    # layer 3: Conv(s2) + BN + LeakyReLU  -- (M, C) (here M=32 < Cout=64)
    a, (N, Ho, Wo) = _patches_mk(x, 4, 2)
    y = _conv_bn_lrelu_mc(a, _w_kc(p["w3"]),
                          p["g3"].reshape(1, -1), p["be3"].reshape(1, -1))
    x = y.reshape(N, Ho, Wo, -1)

    # layers 4 + 5 (fused): Conv(s1)+BN+LeakyReLU, then the 4x4 / Cout=1 conv
    # + sigmoid evaluated on the VMEM-resident layer-4 activation.
    a, (N, Ho, Wo) = _patches_mk(x, 4, 1)
    po, qo = Ho - 1, Wo - 1                    # layer-5 output spatial extent
    w5e = _w5_effective(p["w5"], Ho, Wo)
    out = _conv_bn_lrelu_head(a, _w_kc(p["w4"]),
                              p["g4"].reshape(1, -1), p["be4"].reshape(1, -1),
                              w5e, p["b5"].reshape(1, 1),
                              n_batch=N, hw=Ho * Wo, n_pos=po * qo)
    return out.reshape(N, 1, po, qo)                                  # NCHW


def init_params(key, input_nc, ndf):
    ks = jax.random.split(key, 16)

    def w(k, co, ci):
        return 0.02 * jax.random.normal(k, (co, ci, 4, 4), jnp.float32)

    def v(k, c, base=0.0):
        return base + 0.02 * jax.random.normal(k, (c,), jnp.float32)

    p = {}
    p["w1"], p["b1"] = w(ks[0], ndf, input_nc), v(ks[1], ndf)
    p["w2"] = w(ks[2], ndf * 2, ndf)
    p["g2"], p["be2"] = v(ks[3], ndf * 2, 1.0), v(ks[4], ndf * 2)
    p["w3"] = w(ks[5], ndf * 4, ndf * 2)
    p["g3"], p["be3"] = v(ks[6], ndf * 4, 1.0), v(ks[7], ndf * 4)
    p["w4"] = w(ks[8], ndf * 8, ndf * 4)
    p["g4"], p["be4"] = v(ks[9], ndf * 8, 1.0), v(ks[10], ndf * 8)
    p["w5"], p["b5"] = w(ks[11], 1, ndf * 8), v(ks[12], 1)
    return p


# --------------------------- pure-JAX reference ------------------------------

def _ref_forward(x, p):
    def conv(x, w, b, s):
        y = lax.conv_general_dilated(
            x, w, (s, s), [(1, 1), (1, 1)],
            dimension_numbers=("NCHW", "OIHW", "NCHW"),
            precision=lax.Precision.HIGHEST)
        if b is not None:
            y = y + b[None, :, None, None]
        return y

    def lrelu(y):
        return jnp.where(y > 0, y, LRELU_SLOPE * y)

    def bn_lrelu(y, g, be):
        mean = jnp.mean(y, axis=(0, 2, 3), keepdims=True)
        var = jnp.mean((y - mean) ** 2, axis=(0, 2, 3), keepdims=True)
        y = (y - mean) / jnp.sqrt(var + BN_EPS)
        y = y * g[None, :, None, None] + be[None, :, None, None]
        return lrelu(y)

    y = lrelu(conv(x, p["w1"], p["b1"], 2))
    y = bn_lrelu(conv(y, p["w2"], None, 2), p["g2"], p["be2"])
    y = bn_lrelu(conv(y, p["w3"], None, 2), p["g3"], p["be3"])
    y = bn_lrelu(conv(y, p["w4"], None, 1), p["g4"], p["be4"])
    return jax.nn.sigmoid(conv(y, p["w5"], p["b5"], 1))


if __name__ == "__main__":
    key = jax.random.PRNGKey(0)
    kx, kp = jax.random.split(key)

    # NCHW input matching the PyTorch module (input_nc=4); 32x32 is the smallest
    # spatial size for which all five conv layers of the PatchGAN stay valid.
    x = jax.random.normal(kx, (2, 4, 32, 32), jnp.float32)
    params = init_params(kp, input_nc=4, ndf=16)

    out = jax.block_until_ready(jax.jit(nlayer_discriminator_forward)(x, params))
    assert out.shape == (2, 1, 2, 2), out.shape

    ref = _ref_forward(x, params)
    err = float(jnp.max(jnp.abs(out - ref)))
    # bf16 MXU operands + intentional bf16 inter-layer storage vs. an f32
    # HIGHEST-precision reference; genuine indexing bugs give O(0.5) errors here.
    if err > 1e-1:
        raise ValueError(f"Pallas output mismatch vs reference: max err {err}")

    print("KERNEL_OK")
</pallas_src>

<mosaic_0001>
module attributes {stable_mosaic.version = 11 : i64} {
  func.func @_conv_bias_lrelu_cm_kernel(%arg0: memref<16x64xbf16, #tpu.memory_space<vmem>>, %arg1: memref<64x512xbf16, #tpu.memory_space<vmem>>, %arg2: memref<16x1xf32, #tpu.memory_space<vmem>>, %arg3: memref<16x512xbf16, #tpu.memory_space<vmem>>) attributes {dimension_semantics = [], scalar_prefetch = 0 : i64, scratch_operands = 0 : i64, tpu.core_type = #tpu.core_type<tc>} {
    %c0 = arith.constant 0 : index
    %c0_0 = arith.constant 0 : index
    %0 = vector.load %arg0[%c0, %c0_0] : memref<16x64xbf16, #tpu.memory_space<vmem>>, vector<16x64xbf16>
    %c0_1 = arith.constant 0 : index
    %c0_2 = arith.constant 0 : index
    %1 = vector.load %arg1[%c0_1, %c0_2] : memref<64x512xbf16, #tpu.memory_space<vmem>>, vector<64x512xbf16>
    %cst = arith.constant dense<0.000000e+00> : vector<16x512xf32>
    %2 = tpu.matmul %0, %1, %cst {dimension_numbers = #tpu.dot_dimension_numbers<[1], [0], [0], [1], [0, 0, 1, 1], [], []>} : vector<16x64xbf16>, vector<64x512xbf16>, vector<16x512xf32> -> vector<16x512xf32>
    %c0_3 = arith.constant 0 : index
    %c0_4 = arith.constant 0 : index
    %3 = vector.load %arg2[%c0_3, %c0_4] : memref<16x1xf32, #tpu.memory_space<vmem>>, vector<16x1xf32>
    %4 = vector.broadcast %3 : vector<16x1xf32> to vector<16x512xf32>
    %5 = arith.addf %2, %4 : vector<16x512xf32>
    %cst_5 = arith.constant 0.000000e+00 : f32
    %6 = vector.broadcast %cst_5 : f32 to vector<16x512xf32>
    %7 = arith.cmpf ogt, %5, %6 : vector<16x512xf32>
    %cst_6 = arith.constant 2.000000e-01 : f32
    %8 = vector.broadcast %cst_6 : f32 to vector<16x512xf32>
    %9 = arith.mulf %8, %5 : vector<16x512xf32>
    %10 = arith.select %7, %5, %9 : vector<16x512xi1>, vector<16x512xf32>
    %11 = arith.truncf %10 : vector<16x512xf32> to vector<16x512xbf16>
    %c0_7 = arith.constant 0 : index
    %c0_8 = arith.constant 0 : index
    %12 = vector.load %arg3[%c0_7, %c0_8] : memref<16x512xbf16, #tpu.memory_space<vmem>>, vector<16x512xbf16>
    tpu.vector_store %arg3[%c0_7, %c0_8], %11 {strides = array<i32>} : memref<16x512xbf16, #tpu.memory_space<vmem>>, vector<16x512xbf16>,
    return
  }
}

module attributes {stable_mosaic.version = 11 : i64} {
  func.func @_conv_bn_lrelu_cm_kernel(%arg0: memref<32x256xbf16, #tpu.memory_space<vmem>>, %arg1: memref<256x128xbf16, #tpu.memory_space<vmem>>, %arg2: memref<32x1xf32, #tpu.memory_space<vmem>>, %arg3: memref<32x1xf32, #tpu.memory_space<vmem>>, %arg4: memref<32x128xbf16, #tpu.memory_space<vmem>>) attributes {dimension_semantics = [], scalar_prefetch = 0 : i64, scratch_operands = 0 : i64, tpu.core_type = #tpu.core_type<tc>} {
    %c0 = arith.constant 0 : index
    %c0_0 = arith.constant 0 : index
    %0 = vector.load %arg0[%c0, %c0_0] : memref<32x256xbf16, #tpu.memory_space<vmem>>, vector<32x256xbf16>
    %c0_1 = arith.constant 0 : index
    %c0_2 = arith.constant 0 : index
    %1 = vector.load %arg1[%c0_1, %c0_2] : memref<256x128xbf16, #tpu.memory_space<vmem>>, vector<256x128xbf16>
    %cst = arith.constant dense<0.000000e+00> : vector<32x128xf32>
    %2 = tpu.matmul %0, %1, %cst {dimension_numbers = #tpu.dot_dimension_numbers<[1], [0], [0], [1], [0, 0, 1, 1], [], []>} : vector<32x256xbf16>, vector<256x128xbf16>, vector<32x128xf32> -> vector<32x128xf32>
    %cst_3 = arith.constant dense<0.000000e+00> : vector<32xf32>
    %3 = vector.multi_reduction <add>, %2, %cst_3 [1] : vector<32x128xf32> to vector<32xf32>
    %4 = vector.shape_cast %3 : vector<32xf32> to vector<32x1xf32>
    %cst_4 = arith.constant 1.280000e+02 : f32
    %5 = vector.broadcast %cst_4 : f32 to vector<32x1xf32>
    %6 = arith.divf %4, %5 : vector<32x1xf32>
    %7 = vector.broadcast %6 : vector<32x1xf32> to vector<32x128xf32>
    %8 = arith.subf %2, %7 : vector<32x128xf32>
    %9 = arith.mulf %8, %8 : vector<32x128xf32>
    %cst_5 = arith.constant dense<0.000000e+00> : vector<32xf32>
    %10 = vector.multi_reduction <add>, %9, %cst_5 [1] : vector<32x128xf32> to vector<32xf32>
    %11 = vector.shape_cast %10 : vector<32xf32> to vector<32x1xf32>
    %cst_6 = arith.constant 1.280000e+02 : f32
    %12 = vector.broadcast %cst_6 : f32 to vector<32x1xf32>
    %13 = arith.divf %11, %12 : vector<32x1xf32>
    %c0_7 = arith.constant 0 : index
    %c0_8 = arith.constant 0 : index
    %14 = vector.load %arg2[%c0_7, %c0_8] : memref<32x1xf32, #tpu.memory_space<vmem>>, vector<32x1xf32>
    %cst_9 = arith.constant 9.99999974E-6 : f32
    %15 = vector.broadcast %cst_9 : f32 to vector<32x1xf32>
    %16 = arith.addf %13, %15 : vector<32x1xf32>
    %17 = math.rsqrt %16 : vector<32x1xf32>
    %18 = arith.mulf %14, %17 : vector<32x1xf32>
    %19 = vector.broadcast %6 : vector<32x1xf32> to vector<32x128xf32>
    %20 = arith.subf %2, %19 : vector<32x128xf32>
    %21 = vector.broadcast %18 : vector<32x1xf32> to vector<32x128xf32>
    %22 = arith.mulf %20, %21 : vector<32x128xf32>
    %c0_10 = arith.constant 0 : index
    %c0_11 = arith.constant 0 : index
    %23 = vector.load %arg3[%c0_10, %c0_11] : memref<32x1xf32, #tpu.memory_space<vmem>>, vector<32x1xf32>
    %24 = vector.broadcast %23 : vector<32x1xf32> to vector<32x128xf32>
    %25 = arith.addf %22, %24 : vector<32x128xf32>
    %cst_12 = arith.constant 0.000000e+00 : f32
    %26 = vector.broadcast %cst_12 : f32 to vector<32x128xf32>
    %27 = arith.cmpf ogt, %25, %26 : vector<32x128xf32>
    %cst_13 = arith.constant 2.000000e-01 : f32
    %28 = vector.broadcast %cst_13 : f32 to vector<32x128xf32>
    %29 = arith.mulf %28, %25 : vector<32x128xf32>
    %30 = arith.select %27, %25, %29 : vector<32x128xi1>, vector<32x128xf32>
    %31 = arith.truncf %30 : vector<32x128xf32> to vector<32x128xbf16>
    %c0_14 = arith.constant 0 : index
    %c0_15 = arith.constant 0 : index
    %32 = vector.load %arg4[%c0_14, %c0_15] : memref<32x128xbf16, #tpu.memory_space<vmem>>, vector<32x128xbf16>
    tpu.vector_store %arg4[%c0_14, %c0_15], %31 {strides = array<i32>} : memref<32x128xbf16, #tpu.memory_space<vmem>>, vector<32x128xbf16>,
    return
  }
}

module attributes {stable_mosaic.version = 11 : i64} {
  func.func @_conv_bn_lrelu_mc_kernel(%arg0: memref<32x512xbf16, #tpu.memory_space<vmem>>, %arg1: memref<512x64xbf16, #tpu.memory_space<vmem>>, %arg2: memref<1x64xf32, #tpu.memory_space<vmem>>, %arg3: memref<1x64xf32, #tpu.memory_space<vmem>>, %arg4: memref<32x64xbf16, #tpu.memory_space<vmem>>) attributes {dimension_semantics = [], scalar_prefetch = 0 : i64, scratch_operands = 0 : i64, tpu.core_type = #tpu.core_type<tc>} {
    %c0 = arith.constant 0 : index
    %c0_0 = arith.constant 0 : index
    %0 = vector.load %arg0[%c0, %c0_0] : memref<32x512xbf16, #tpu.memory_space<vmem>>, vector<32x512xbf16>
    %c0_1 = arith.constant 0 : index
    %c0_2 = arith.constant 0 : index
    %1 = vector.load %arg1[%c0_1, %c0_2] : memref<512x64xbf16, #tpu.memory_space<vmem>>, vector<512x64xbf16>
    %cst = arith.constant dense<0.000000e+00> : vector<32x64xf32>
    %2 = tpu.matmul %0, %1, %cst {dimension_numbers = #tpu.dot_dimension_numbers<[1], [0], [0], [1], [0, 0, 1, 1], [], []>} : vector<32x512xbf16>, vector<512x64xbf16>, vector<32x64xf32> -> vector<32x64xf32>
    %cst_3 = arith.constant dense<0.000000e+00> : vector<64xf32>
    %3 = vector.multi_reduction <add>, %2, %cst_3 [0] : vector<32x64xf32> to vector<64xf32>
    %4 = vector.shape_cast %3 : vector<64xf32> to vector<1x64xf32>
    %cst_4 = arith.constant 3.200000e+01 : f32
    %5 = vector.broadcast %cst_4 : f32 to vector<1x64xf32>
    %6 = arith.divf %4, %5 : vector<1x64xf32>
    %7 = vector.broadcast %6 : vector<1x64xf32> to vector<32x64xf32>
    %8 = arith.subf %2, %7 : vector<32x64xf32>
    %9 = arith.mulf %8, %8 : vector<32x64xf32>
    %cst_5 = arith.constant dense<0.000000e+00> : vector<64xf32>
    %10 = vector.multi_reduction <add>, %9, %cst_5 [0] : vector<32x64xf32> to vector<64xf32>
    %11 = vector.shape_cast %10 : vector<64xf32> to vector<1x64xf32>
    %cst_6 = arith.constant 3.200000e+01 : f32
    %12 = vector.broadcast %cst_6 : f32 to vector<1x64xf32>
    %13 = arith.divf %11, %12 : vector<1x64xf32>
    %c0_7 = arith.constant 0 : index
    %c0_8 = arith.constant 0 : index
    %14 = vector.load %arg2[%c0_7, %c0_8] : memref<1x64xf32, #tpu.memory_space<vmem>>, vector<1x64xf32>
    %cst_9 = arith.constant 9.99999974E-6 : f32
    %15 = vector.broadcast %cst_9 : f32 to vector<1x64xf32>
    %16 = arith.addf %13, %15 : vector<1x64xf32>
    %17 = math.rsqrt %16 : vector<1x64xf32>
    %18 = arith.mulf %14, %17 : vector<1x64xf32>
    %19 = vector.broadcast %6 : vector<1x64xf32> to vector<32x64xf32>
    %20 = arith.subf %2, %19 : vector<32x64xf32>
    %21 = vector.broadcast %18 : vector<1x64xf32> to vector<32x64xf32>
    %22 = arith.mulf %20, %21 : vector<32x64xf32>
    %c0_10 = arith.constant 0 : index
    %c0_11 = arith.constant 0 : index
    %23 = vector.load %arg3[%c0_10, %c0_11] : memref<1x64xf32, #tpu.memory_space<vmem>>, vector<1x64xf32>
    %24 = vector.broadcast %23 : vector<1x64xf32> to vector<32x64xf32>
    %25 = arith.addf %22, %24 : vector<32x64xf32>
    %cst_12 = arith.constant 0.000000e+00 : f32
    %26 = vector.broadcast %cst_12 : f32 to vector<32x64xf32>
    %27 = arith.cmpf ogt, %25, %26 : vector<32x64xf32>
    %cst_13 = arith.constant 2.000000e-01 : f32
    %28 = vector.broadcast %cst_13 : f32 to vector<32x64xf32>
    %29 = arith.mulf %28, %25 : vector<32x64xf32>
    %30 = arith.select %27, %25, %29 : vector<32x64xi1>, vector<32x64xf32>
    %31 = arith.truncf %30 : vector<32x64xf32> to vector<32x64xbf16>
    %c0_14 = arith.constant 0 : index
    %c0_15 = arith.constant 0 : index
    %32 = vector.load %arg4[%c0_14, %c0_15] : memref<32x64xbf16, #tpu.memory_space<vmem>>, vector<32x64xbf16>
    tpu.vector_store %arg4[%c0_14, %c0_15], %31 {strides = array<i32>} : memref<32x64xbf16, #tpu.memory_space<vmem>>, vector<32x64xbf16>,
    return
  }
}

module attributes {stable_mosaic.version = 11 : i64} {
  func.func @_conv_bn_lrelu_sigmoid_head_kernel(%arg0: memref<18x1024xbf16, #tpu.memory_space<vmem>>, %arg1: memref<1024x128xbf16, #tpu.memory_space<vmem>>, %arg2: memref<1x128xf32, #tpu.memory_space<vmem>>, %arg3: memref<1x128xf32, #tpu.memory_space<vmem>>, %arg4: memref<9x4x128xf32, #tpu.memory_space<vmem>>, %arg5: memref<1x1xf32, #tpu.memory_space<vmem>>, %arg6: memref<8x1xf32, #tpu.memory_space<vmem>>) attributes {dimension_semantics = [], scalar_prefetch = 0 : i64, scratch_operands = 0 : i64, tpu.core_type = #tpu.core_type<tc>} {
    %c0 = arith.constant 0 : index
    %c0_0 = arith.constant 0 : index
    %0 = vector.load %arg0[%c0, %c0_0] : memref<18x1024xbf16, #tpu.memory_space<vmem>>, vector<18x1024xbf16>
    %c0_1 = arith.constant 0 : index
    %c0_2 = arith.constant 0 : index
    %1 = vector.load %arg1[%c0_1, %c0_2] : memref<1024x128xbf16, #tpu.memory_space<vmem>>, vector<1024x128xbf16>
    %cst = arith.constant dense<0.000000e+00> : vector<18x128xf32>
    %2 = tpu.matmul %0, %1, %cst {dimension_numbers = #tpu.dot_dimension_numbers<[1], [0], [0], [1], [0, 0, 1, 1], [], []>} : vector<18x1024xbf16>, vector<1024x128xbf16>, vector<18x128xf32> -> vector<18x128xf32>
    %cst_3 = arith.constant dense<0.000000e+00> : vector<128xf32>
    %3 = vector.multi_reduction <add>, %2, %cst_3 [0] : vector<18x128xf32> to vector<128xf32>
    %4 = vector.shape_cast %3 : vector<128xf32> to vector<1x128xf32>
    %cst_4 = arith.constant 1.800000e+01 : f32
    %5 = vector.broadcast %cst_4 : f32 to vector<1x128xf32>
    %6 = arith.divf %4, %5 : vector<1x128xf32>
    %7 = vector.broadcast %6 : vector<1x128xf32> to vector<18x128xf32>
    %8 = arith.subf %2, %7 : vector<18x128xf32>
    %9 = arith.mulf %8, %8 : vector<18x128xf32>
    %cst_5 = arith.constant dense<0.000000e+00> : vector<128xf32>
    %10 = vector.multi_reduction <add>, %9, %cst_5 [0] : vector<18x128xf32> to vector<128xf32>
    %11 = vector.shape_cast %10 : vector<128xf32> to vector<1x128xf32>
    %cst_6 = arith.constant 1.800000e+01 : f32
    %12 = vector.broadcast %cst_6 : f32 to vector<1x128xf32>
    %13 = arith.divf %11, %12 : vector<1x128xf32>
    %c0_7 = arith.constant 0 : index
    %c0_8 = arith.constant 0 : index
    %14 = vector.load %arg2[%c0_7, %c0_8] : memref<1x128xf32, #tpu.memory_space<vmem>>, vector<1x128xf32>
    %cst_9 = arith.constant 9.99999974E-6 : f32
    %15 = vector.broadcast %cst_9 : f32 to vector<1x128xf32>
    %16 = arith.addf %13, %15 : vector<1x128xf32>
    %17 = math.rsqrt %16 : vector<1x128xf32>
    %18 = arith.mulf %14, %17 : vector<1x128xf32>
    %19 = vector.broadcast %6 : vector<1x128xf32> to vector<18x128xf32>
    %20 = arith.subf %2, %19 : vector<18x128xf32>
    %21 = vector.broadcast %18 : vector<1x128xf32> to vector<18x128xf32>
    %22 = arith.mulf %20, %21 : vector<18x128xf32>
    %c0_10 = arith.constant 0 : index
    %c0_11 = arith.constant 0 : index
    %23 = vector.load %arg3[%c0_10, %c0_11] : memref<1x128xf32, #tpu.memory_space<vmem>>, vector<1x128xf32>
    %24 = vector.broadcast %23 : vector<1x128xf32> to vector<18x128xf32>
    %25 = arith.addf %22, %24 : vector<18x128xf32>
    %cst_12 = arith.constant 0.000000e+00 : f32
    %26 = vector.broadcast %cst_12 : f32 to vector<18x128xf32>
    %27 = arith.cmpf ogt, %25, %26 : vector<18x128xf32>
    %cst_13 = arith.constant 2.000000e-01 : f32
    %28 = vector.broadcast %cst_13 : f32 to vector<18x128xf32>
    %29 = arith.mulf %28, %25 : vector<18x128xf32>
    %30 = arith.select %27, %25, %29 : vector<18x128xi1>, vector<18x128xf32>
    %cst_14 = arith.constant 0.000000e+00 : f32
    %31 = vector.broadcast %cst_14 : f32 to vector<4x128xf32>
    %c0_15 = arith.constant 0 : index
    %c0_16 = arith.constant 0 : index
    %c0_17 = arith.constant 0 : index
    %32 = vector.load %arg4[%c0_15, %c0_16, %c0_17] : memref<9x4x128xf32, #tpu.memory_space<vmem>>, vector<1x4x128xf32>
    %33 = vector.shape_cast %32 : vector<1x4x128xf32> to vector<4x128xf32>
    %34 = vector.extract_strided_slice %30 {offsets = [0, 0], sizes = [1, 128], strides = [1, 1]} : vector<18x128xf32> to vector<1x128xf32>
    %35 = vector.broadcast %34 : vector<1x128xf32> to vector<4x128xf32>
    %36 = arith.mulf %33, %35 : vector<4x128xf32>
    %37 = arith.addf %31, %36 : vector<4x128xf32>
    %c1 = arith.constant 1 : index
    %c0_18 = arith.constant 0 : index
    %c0_19 = arith.constant 0 : index
    %38 = vector.load %arg4[%c1, %c0_18, %c0_19] : memref<9x4x128xf32, #tpu.memory_space<vmem>>, vector<1x4x128xf32>
    %39 = vector.shape_cast %38 : vector<1x4x128xf32> to vector<4x128xf32>
    %40 = vector.extract_strided_slice %30 {offsets = [1, 0], sizes = [1, 128], strides = [1, 1]} : vector<18x128xf32> to vector<1x128xf32>
    %41 = vector.broadcast %40 : vector<1x128xf32> to vector<4x128xf32>
    %42 = arith.mulf %39, %41 : vector<4x128xf32>
    %43 = arith.addf %37, %42 : vector<4x128xf32>
    %c2 = arith.constant 2 : index
    %c0_20 = arith.constant 0 : index
    %c0_21 = arith.constant 0 : index
    %44 = vector.load %arg4[%c2, %c0_20, %c0_21] : memref<9x4x128xf32, #tpu.memory_space<vmem>>, vector<1x4x128xf32>
    %45 = vector.shape_cast %44 : vector<1x4x128xf32> to vector<4x128xf32>
    %46 = vector.extract_strided_slice %30 {offsets = [2, 0], sizes = [1, 128], strides = [1, 1]} : vector<18x128xf32> to vector<1x128xf32>
    %47 = vector.broadcast %46 : vector<1x128xf32> to vector<4x128xf32>
    %48 = arith.mulf %45, %47 : vector<4x128xf32>
    %49 = arith.addf %43, %48 : vector<4x128xf32>
    %c3 = arith.constant 3 : index
    %c0_22 = arith.constant 0 : index
    %c0_23 = arith.constant 0 : index
    %50 = vector.load %arg4[%c3, %c0_22, %c0_23] : memref<9x4x128xf32, #tpu.memory_space<vmem>>, vector<1x4x128xf32>
    %51 = vector.shape_cast %50 : vector<1x4x128xf32> to vector<4x128xf32>
    %52 = vector.extract_strided_slice %30 {offsets = [3, 0], sizes = [1, 128], strides = [1, 1]} : vector<18x128xf32> to vector<1x128xf32>
    %53 = vector.broadcast %52 : vector<1x128xf32> to vector<4x128xf32>
    %54 = arith.mulf %51, %53 : vector<4x128xf32>
    %55 = arith.addf %49, %54 : vector<4x128xf32>
    %c4 = arith.constant 4 : index
    %c0_24 = arith.constant 0 : index
    %c0_25 = arith.constant 0 : index
    %56 = vector.load %arg4[%c4, %c0_24, %c0_25] : memref<9x4x128xf32, #tpu.memory_space<vmem>>, vector<1x4x128xf32>
    %57 = vector.shape_cast %56 : vector<1x4x128xf32> to vector<4x128xf32>
    %58 = vector.extract_strided_slice %30 {offsets = [4, 0], sizes = [1, 128], strides = [1, 1]} : vector<18x128xf32> to vector<1x128xf32>
    %59 = vector.broadcast %58 : vector<1x128xf32> to vector<4x128xf32>
    %60 = arith.mulf %57, %59 : vector<4x128xf32>
    %61 = arith.addf %55, %60 : vector<4x128xf32>
    %c5 = arith.constant 5 : index
    %c0_26 = arith.constant 0 : index
    %c0_27 = arith.constant 0 : index
    %62 = vector.load %arg4[%c5, %c0_26, %c0_27] : memref<9x4x128xf32, #tpu.memory_space<vmem>>, vector<1x4x128xf32>
    %63 = vector.shape_cast %62 : vector<1x4x128xf32> to vector<4x128xf32>
    %64 = vector.extract_strided_slice %30 {offsets = [5, 0], sizes = [1, 128], strides = [1, 1]} : vector<18x128xf32> to vector<1x128xf32>
    %65 = vector.broadcast %64 : vector<1x128xf32> to vector<4x128xf32>
    %66 = arith.mulf %63, %65 : vector<4x128xf32>
    %67 = arith.addf %61, %66 : vector<4x128xf32>
    %c6 = arith.constant 6 : index
    %c0_28 = arith.constant 0 : index
    %c0_29 = arith.constant 0 : index
    %68 = vector.load %arg4[%c6, %c0_28, %c0_29] : memref<9x4x128xf32, #tpu.memory_space<vmem>>, vector<1x4x128xf32>
    %69 = vector.shape_cast %68 : vector<1x4x128xf32> to vector<4x128xf32>
    %70 = vector.extract_strided_slice %30 {offsets = [6, 0], sizes = [1, 128], strides = [1, 1]} : vector<18x128xf32> to vector<1x128xf32>
    %71 = vector.broadcast %70 : vector<1x128xf32> to vector<4x128xf32>
    %72 = arith.mulf %69, %71 : vector<4x128xf32>
    %73 = arith.addf %67, %72 : vector<4x128xf32>
    %c7 = arith.constant 7 : index
    %c0_30 = arith.constant 0 : index
    %c0_31 = arith.constant 0 : index
    %74 = vector.load %arg4[%c7, %c0_30, %c0_31] : memref<9x4x128xf32, #tpu.memory_space<vmem>>, vector<1x4x128xf32>
    %75 = vector.shape_cast %74 : vector<1x4x128xf32> to vector<4x128xf32>
    %76 = vector.extract_strided_slice %30 {offsets = [7, 0], sizes = [1, 128], strides = [1, 1]} : vector<18x128xf32> to vector<1x128xf32>
    %77 = vector.broadcast %76 : vector<1x128xf32> to vector<4x128xf32>
    %78 = arith.mulf %75, %77 : vector<4x128xf32>
    %79 = arith.addf %73, %78 : vector<4x128xf32>
    %c8 = arith.constant 8 : index
    %c0_32 = arith.constant 0 : index
    %c0_33 = arith.constant 0 : index
    %80 = vector.load %arg4[%c8, %c0_32, %c0_33] : memref<9x4x128xf32, #tpu.memory_space<vmem>>, vector<1x4x128xf32>
    %81 = vector.shape_cast %80 : vector<1x4x128xf32> to vector<4x128xf32>
    %82 = vector.extract_strided_slice %30 {offsets = [8, 0], sizes = [1, 128], strides = [1, 1]} : vector<18x128xf32> to vector<1x128xf32>
    %83 = vector.broadcast %82 : vector<1x128xf32> to vector<4x128xf32>
    %84 = arith.mulf %81, %83 : vector<4x128xf32>
    %85 = arith.addf %79, %84 : vector<4x128xf32>
    %cst_34 = arith.constant dense<0.000000e+00> : vector<4xf32>
    %86 = vector.multi_reduction <add>, %85, %cst_34 [1] : vector<4x128xf32> to vector<4xf32>
    %87 = vector.shape_cast %86 : vector<4xf32> to vector<4x1xf32>
    %c0_35 = arith.constant 0 : index
    %c0_36 = arith.constant 0 : index
    %88 = vector.load %arg5[%c0_35, %c0_36] : memref<1x1xf32, #tpu.memory_space<vmem>>, vector<1x1xf32>
    %89 = vector.broadcast %88 : vector<1x1xf32> to vector<4x1xf32>
    %90 = arith.addf %87, %89 : vector<4x1xf32>
    %91 = math.absf %90 : vector<4x1xf32>
    %cst_37 = arith.constant 0.000000e+00 : f32
    %92 = vector.broadcast %cst_37 : f32 to vector<4x1xf32>
    %93 = arith.subf %92, %91 : vector<4x1xf32>
    %94 = math.exp %93 : vector<4x1xf32>
    %cst_38 = arith.constant 0.000000e+00 : f32
    %95 = vector.broadcast %cst_38 : f32 to vector<4x1xf32>
    %96 = arith.cmpf oge, %90, %95 : vector<4x1xf32>
    %cst_39 = arith.constant 1.000000e+00 : f32
    %97 = vector.broadcast %cst_39 : f32 to vector<4x1xf32>
    %98 = arith.addf %97, %94 : vector<4x1xf32>
    %cst_40 = arith.constant 1.000000e+00 : f32
    %99 = vector.broadcast %cst_40 : f32 to vector<4x1xf32>
    %100 = arith.divf %99, %98 : vector<4x1xf32>
    %cst_41 = arith.constant 1.000000e+00 : f32
    %101 = vector.broadcast %cst_41 : f32 to vector<4x1xf32>
    %102 = arith.addf %101, %94 : vector<4x1xf32>
    %103 = arith.divf %94, %102 : vector<4x1xf32>
    %104 = arith.select %96, %100, %103 : vector<4x1xi1>, vector<4x1xf32>
    %c0_42 = arith.constant 0 : index
    %c0_43 = arith.constant 0 : index
    %105 = vector.load %arg6[%c0_42, %c0_43] : memref<8x1xf32, #tpu.memory_space<vmem>>, vector<4x1xf32>
    tpu.vector_store %arg6[%c0_42, %c0_43], %104 {strides = array<i32>} : memref<8x1xf32, #tpu.memory_space<vmem>>, vector<4x1xf32>,
    %cst_44 = arith.constant 0.000000e+00 : f32
    %106 = vector.broadcast %cst_44 : f32 to vector<4x128xf32>
    %c0_45 = arith.constant 0 : index
    %c0_46 = arith.constant 0 : index
    %c0_47 = arith.constant 0 : index
    %107 = vector.load %arg4[%c0_45, %c0_46, %c0_47] : memref<9x4x128xf32, #tpu.memory_space<vmem>>, vector<1x4x128xf32>
    %108 = vector.shape_cast %107 : vector<1x4x128xf32> to vector<4x128xf32>
    %109 = vector.extract_strided_slice %30 {offsets = [9, 0], sizes = [1, 128], strides = [1, 1]} : vector<18x128xf32> to vector<1x128xf32>
    %110 = vector.broadcast %109 : vector<1x128xf32> to vector<4x128xf32>
    %111 = arith.mulf %108, %110 : vector<4x128xf32>
    %112 = arith.addf %106, %111 : vector<4x128xf32>
    %c1_48 = arith.constant 1 : index
    %c0_49 = arith.constant 0 : index
    %c0_50 = arith.constant 0 : index
    %113 = vector.load %arg4[%c1_48, %c0_49, %c0_50] : memref<9x4x128xf32, #tpu.memory_space<vmem>>, vector<1x4x128xf32>
    %114 = vector.shape_cast %113 : vector<1x4x128xf32> to vector<4x128xf32>
    %115 = vector.extract_strided_slice %30 {offsets = [10, 0], sizes = [1, 128], strides = [1, 1]} : vector<18x128xf32> to vector<1x128xf32>
    %116 = vector.broadcast %115 : vector<1x128xf32> to vector<4x128xf32>
    %117 = arith.mulf %114, %116 : vector<4x128xf32>
    %118 = arith.addf %112, %117 : vector<4x128xf32>
    %c2_51 = arith.constant 2 : index
    %c0_52 = arith.constant 0 : index
    %c0_53 = arith.constant 0 : index
    %119 = vector.load %arg4[%c2_51, %c0_52, %c0_53] : memref<9x4x128xf32, #tpu.memory_space<vmem>>, vector<1x4x128xf32>
    %120 = vector.shape_cast %119 : vector<1x4x128xf32> to vector<4x128xf32>
    %121 = vector.extract_strided_slice %30 {offsets = [11, 0], sizes = [1, 128], strides = [1, 1]} : vector<18x128xf32> to vector<1x128xf32>
    %122 = vector.broadcast %121 : vector<1x128xf32> to vector<4x128xf32>
    %123 = arith.mulf %120, %122 : vector<4x128xf32>
    %124 = arith.addf %118, %123 : vector<4x128xf32>
    %c3_54 = arith.constant 3 : index
    %c0_55 = arith.constant 0 : index
    %c0_56 = arith.constant 0 : index
    %125 = vector.load %arg4[%c3_54, %c0_55, %c0_56] : memref<9x4x128xf32, #tpu.memory_space<vmem>>, vector<1x4x128xf32>
    %126 = vector.shape_cast %125 : vector<1x4x128xf32> to vector<4x128xf32>
    %127 = vector.extract_strided_slice %30 {offsets = [12, 0], sizes = [1, 128], strides = [1, 1]} : vector<18x128xf32> to vector<1x128xf32>
    %128 = vector.broadcast %127 : vector<1x128xf32> to vector<4x128xf32>
    %129 = arith.mulf %126, %128 : vector<4x128xf32>
    %130 = arith.addf %124, %129 : vector<4x128xf32>
    %c4_57 = arith.constant 4 : index
    %c0_58 = arith.constant 0 : index
    %c0_59 = arith.constant 0 : index
    %131 = vector.load %arg4[%c4_57, %c0_58, %c0_59] : memref<9x4x128xf32, #tpu.memory_space<vmem>>, vector<1x4x128xf32>
    %132 = vector.shape_cast %131 : vector<1x4x128xf32> to vector<4x128xf32>
    %133 = vector.extract_strided_slice %30 {offsets = [13, 0], sizes = [1, 128], strides = [1, 1]} : vector<18x128xf32> to vector<1x128xf32>
    %134 = vector.broadcast %133 : vector<1x128xf32> to vector<4x128xf32>
    %135 = arith.mulf %132, %134 : vector<4x128xf32>
    %136 = arith.addf %130, %135 : vector<4x128xf32>
    %c5_60 = arith.constant 5 : index
    %c0_61 = arith.constant 0 : index
    %c0_62 = arith.constant 0 : index
    %137 = vector.load %arg4[%c5_60, %c0_61, %c0_62] : memref<9x4x128xf32, #tpu.memory_space<vmem>>, vector<1x4x128xf32>
    %138 = vector.shape_cast %137 : vector<1x4x128xf32> to vector<4x128xf32>
    %139 = vector.extract_strided_slice %30 {offsets = [14, 0], sizes = [1, 128], strides = [1, 1]} : vector<18x128xf32> to vector<1x128xf32>
    %140 = vector.broadcast %139 : vector<1x128xf32> to vector<4x128xf32>
    %141 = arith.mulf %138, %140 : vector<4x128xf32>
    %142 = arith.addf %136, %141 : vector<4x128xf32>
    %c6_63 = arith.constant 6 : index
    %c0_64 = arith.constant 0 : index
    %c0_65 = arith.constant 0 : index
    %143 = vector.load %arg4[%c6_63, %c0_64, %c0_65] : memref<9x4x128xf32, #tpu.memory_space<vmem>>, vector<1x4x128xf32>
    %144 = vector.shape_cast %143 : vector<1x4x128xf32> to vector<4x128xf32>
    %145 = vector.extract_strided_slice %30 {offsets = [15, 0], sizes = [1, 128], strides = [1, 1]} : vector<18x128xf32> to vector<1x128xf32>
    %146 = vector.broadcast %145 : vector<1x128xf32> to vector<4x128xf32>
    %147 = arith.mulf %144, %146 : vector<4x128xf32>
    %148 = arith.addf %142, %147 : vector<4x128xf32>
    %c7_66 = arith.constant 7 : index
    %c0_67 = arith.constant 0 : index
    %c0_68 = arith.constant 0 : index
    %149 = vector.load %arg4[%c7_66, %c0_67, %c0_68] : memref<9x4x128xf32, #tpu.memory_space<vmem>>, vector<1x4x128xf32>
    %150 = vector.shape_cast %149 : vector<1x4x128xf32> to vector<4x128xf32>
    %151 = vector.extract_strided_slice %30 {offsets = [16, 0], sizes = [1, 128], strides = [1, 1]} : vector<18x128xf32> to vector<1x128xf32>
    %152 = vector.broadcast %151 : vector<1x128xf32> to vector<4x128xf32>
    %153 = arith.mulf %150, %152 : vector<4x128xf32>
    %154 = arith.addf %148, %153 : vector<4x128xf32>
    %c8_69 = arith.constant 8 : index
    %c0_70 = arith.constant 0 : index
    %c0_71 = arith.constant 0 : index
    %155 = vector.load %arg4[%c8_69, %c0_70, %c0_71] : memref<9x4x128xf32, #tpu.memory_space<vmem>>, vector<1x4x128xf32>
    %156 = vector.shape_cast %155 : vector<1x4x128xf32> to vector<4x128xf32>
    %157 = vector.extract_strided_slice %30 {offsets = [17, 0], sizes = [1, 128], strides = [1, 1]} : vector<18x128xf32> to vector<1x128xf32>
    %158 = vector.broadcast %157 : vector<1x128xf32> to vector<4x128xf32>
    %159 = arith.mulf %156, %158 : vector<4x128xf32>
    %160 = arith.addf %154, %159 : vector<4x128xf32>
    %cst_72 = arith.constant dense<0.000000e+00> : vector<4xf32>
    %161 = vector.multi_reduction <add>, %160, %cst_72 [1] : vector<4x128xf32> to vector<4xf32>
    %162 = vector.shape_cast %161 : vector<4xf32> to vector<4x1xf32>
    %c0_73 = arith.constant 0 : index
    %c0_74 = arith.constant 0 : index
    %163 = vector.load %arg5[%c0_73, %c0_74] : memref<1x1xf32, #tpu.memory_space<vmem>>, vector<1x1xf32>
    %164 = vector.broadcast %163 : vector<1x1xf32> to vector<4x1xf32>
    %165 = arith.addf %162, %164 : vector<4x1xf32>
    %166 = math.absf %165 : vector<4x1xf32>
    %cst_75 = arith.constant 0.000000e+00 : f32
    %167 = vector.broadcast %cst_75 : f32 to vector<4x1xf32>
    %168 = arith.subf %167, %166 : vector<4x1xf32>
    %169 = math.exp %168 : vector<4x1xf32>
    %cst_76 = arith.constant 0.000000e+00 : f32
    %170 = vector.broadcast %cst_76 : f32 to vector<4x1xf32>
    %171 = arith.cmpf oge, %165, %170 : vector<4x1xf32>
    %cst_77 = arith.constant 1.000000e+00 : f32
    %172 = vector.broadcast %cst_77 : f32 to vector<4x1xf32>
    %173 = arith.addf %172, %169 : vector<4x1xf32>
    %cst_78 = arith.constant 1.000000e+00 : f32
    %174 = vector.broadcast %cst_78 : f32 to vector<4x1xf32>
    %175 = arith.divf %174, %173 : vector<4x1xf32>
    %cst_79 = arith.constant 1.000000e+00 : f32
    %176 = vector.broadcast %cst_79 : f32 to vector<4x1xf32>
    %177 = arith.addf %176, %169 : vector<4x1xf32>
    %178 = arith.divf %169, %177 : vector<4x1xf32>
    %179 = arith.select %171, %175, %178 : vector<4x1xi1>, vector<4x1xf32>
    %c4_80 = arith.constant 4 : index
    %c0_81 = arith.constant 0 : index
    %180 = vector.load %arg6[%c4_80, %c0_81] : memref<8x1xf32, #tpu.memory_space<vmem>>, vector<4x1xf32>
    tpu.vector_store %arg6[%c4_80, %c0_81], %179 {strides = array<i32>} : memref<8x1xf32, #tpu.memory_space<vmem>>, vector<4x1xf32>,
    return
  }
}

</mosaic_0001>

<bundles_post_ra>
// kernel: nlayer_discriminator_forward.4
= control target key start
LH: loop header
LB: loop body
LE: loop exit
PB: predicated region body
PF: predicated region fallthrough
CT: control target
= control target key end

     0   :  { %v330_v1 = vmov 0   ;;  %vm130_vm0 = vcmask 523264   ;;  %s420_s1 = inlined_call_operand.vmem [shape: bf16[64,512], index: 1, kind: input, shape index: {}]   ;;  %s421_s2 = inlined_call_operand.vmem [shape: f32[16,1], index: 2, kind: input, shape index: {}]   ;;  %s422_s0 = inlined_call_operand.vmem [shape: bf16[16,64], index: 0, kind: input, shape index: {}]   ;;  %s423_s3 = inlined_call_operand.vmem [shape: bf16[16,512], index: 3, kind: output, shape index: {}]  }
   0x1   :  { %v305_v0 = vld [vmem:[%s420_s1 + $0x64] ss:$16 sps:$4 sm:$0xff]   ;;  %166 = vmatprep.mubr.bf16.mxu0 %v330_v1  ;;  %209 = vmatprep.mubr.bf16.mxu1 %v330_v1  ;;  %v307_v2 = vld [vmem:[%s420_s1 + $0x6c] ss:$16 sps:$4 sm:$0xff]   ;;  %v309_v3 = vld [vmem:[%s420_s1 + $0x60] ss:$16 sps:$4 sm:$0xff]  }
   0x2   :  { %304 = vset.pattern.permute.xlu0 %v330_v1  ;;  %142 = vmatprep.subr.bf16.mxu0 %v305_v0  ;;  %v310_v4 = vld [vmem:[%s420_s1 + $0x68] ss:$16 sps:$4 sm:$0xff]   ;;  %v311_v5 = vld [vmem:[%s420_s1 + $0x44] ss:$16 sps:$4 sm:$0xff]   ;;  %v313_v6 = vld [vmem:[%s420_s1 + $0x4c] ss:$16 sps:$4 sm:$0xff]  }
   0x3   :  { %185 = vmatprep.subr.bf16.mxu1 %v307_v2  ;;  %143 = vmatpush1.bf16.msra.mxu0 %v309_v3  ;;  %v315_v7 = vld [vmem:[%s420_s1 + $0x40] ss:$16 sps:$4 sm:$0xff]   ;;  %v316_v8 = vld [vmem:[%s420_s1 + $0x48] ss:$16 sps:$4 sm:$0xff]   ;;  %v317_v9 = vld [vmem:[%s420_s1 + $0x24] ss:$16 sps:$4 sm:$0xff]  }
   0x4   :  { %186 = vmatpush1.bf16.msra.mxu1 %v310_v4  ;;  %144 = vmatprep.subr.bf16.mxu0 %v311_v5  ;;  %v319_v10 = vld [vmem:[%s420_s1 + $0x2c] ss:$16 sps:$4 sm:$0xff]   ;;  %v321_v11 = vld [vmem:[%s420_s1 + $0x20] ss:$16 sps:$4 sm:$0xff]   ;;  %v322_v12 = vld [vmem:[%s420_s1 + $0x28] ss:$16 sps:$4 sm:$0xff]  }
   0x5   :  { %187 = vmatprep.subr.bf16.mxu1 %v313_v6  ;;  %v323_v13 = vld [vmem:[%s420_s1 + $0x4] ss:$16 sps:$4 sm:$0xff]   ;;  %v325_v14 = vld [vmem:[%s420_s1 + $0xc] ss:$16 sps:$4 sm:$0xff]   ;;  %v327_v16 = vld [vmem:[%s420_s1] ss:$16 sps:$4 sm:$0xff]  }
   0x6   :  { %v33_v15 = vld [vmem:[%s421_s2] sm:$0xff]  ;;  %v328_v17 = vld [vmem:[%s420_s1 + $0x8] ss:$16 sps:$4 sm:$0xff]  }
   0x7   :  { %145 = vmatpush1.bf16.msra.mxu0 %v315_v7  ;;  %37 = vperm.xlu0 %304, %v33_v15   ;;  %v329_v18 = vld [vmem:[%s422_s0] sm:$0xff]   ;;  %v34_v19 = vld [vmem:[%s421_s2 + $0x8] sm:$0xff] }
   0x8   :  { %188 = vmatpush1.bf16.msra.mxu1 %v316_v8  ;;  %146 = vmatprep.subr.bf16.mxu0 %v317_v9 }
   0x9   :  { %189 = vmatprep.subr.bf16.mxu1 %v319_v10 }
   0xb   :  { %147 = vmatpush1.bf16.msra.mxu0 %v321_v11  ;;  %42 = vperm.xlu0 %304, %v34_v19  }
   0xc   :  { %190 = vmatpush1.bf16.msra.mxu1 %v322_v12  ;;  %148 = vmatprep.subr.bf16.mxu0 %v323_v13 }
   0xd   :  { %191 = vmatprep.subr.bf16.mxu1 %v325_v14 }
   0xf   :  { %149 = vmatpush1.bf16.msra.mxu0 %v327_v16 }
  0x10   :  { %192 = vmatpush1.bf16.msra.mxu1 %v328_v17 }
  0x12   :  { %293 = vmatmul.mubr.msk.bf16.vlgmr.msra.gmra.mxu0 %vm130_vm0, %v329_v18 }
  0x13   :  { %294 = vmatmul.mubr.msk.bf16.vlgmr.msra.gmra.mxu1 %vm130_vm0, %v329_v18 }
  0x82   :  { %v38_v20 = vpop.permute.xlu0 %37 }
  0x86   :  { %v43_v29 = vpop.permute.xlu0 %42 }
  0xd2   :  { %v168_v21 = vpop.f32.mrf.mxu0 }
  0xd3   :  { %v211_v22 = vpop.f32.mrf.mxu1  ;;  %v169_v23 = vadd.f32 %v168_v21, %v38_v20 }
  0xd4   :  { %v212_v24 = vadd.f32 %v211_v22, %v38_v20  ;;  %v170_v25 = vpop.f32.mrf.mxu0 }
  0xd5   :  { %v213_v26 = vpop.f32.mrf.mxu1  ;;  %v228_v27 = vmul.f32 0.2, %v169_v23  ;;  %vm220_vm1 = vcmp.gt.f32.partialorder %v169_v23, 0.0  ;;  %v171_v30 = vadd.f32 %v170_v25, %v38_v20 }
  0xd6   :  { %v230_v28 = vmul.f32 0.2, %v212_v24  ;;  %vm222_vm2 = vcmp.gt.f32.partialorder %v212_v24, 0.0  ;;  %v214_v31 = vadd.f32 %v213_v26, %v38_v20  ;;  %v172_v32 = vpop.f32.mrf.mxu0 }
  0xd7   :  { %v215_v33 = vpop.f32.mrf.mxu1  ;;  %v173_v34 = vadd.f32 %v172_v32, %v43_v29  ;;  %vm221_vm3 = vcmp.gt.f32.partialorder %v171_v30, 0.0  ;;  %v229_v36 = vmul.f32 0.2, %v171_v30  ;;  %v236_v40 = vsel %vm220_vm1, %v169_v23, %v228_v27 }
  0xd8   :  { %v216_v35 = vadd.f32 %v215_v33, %v43_v29  ;;  %vm223_vm4 = vcmp.gt.f32.partialorder %v214_v31, 0.0  ;;  %v231_v37 = vmul.f32 0.2, %v214_v31  ;;  %v174_v38 = vpop.f32.mrf.mxu0  ;;  %v238_v41 = vsel %vm222_vm2, %v212_v24, %v230_v28 }
  0xd9   :  { %v217_v39 = vpop.f32.mrf.mxu1  ;;  %v232_v42 = vmul.f32 0.2, %v173_v34  ;;  %v237_v44 = vsel %vm221_vm3, %v171_v30, %v229_v36  ;;  %v175_v46 = vadd.f32 %v174_v38, %v43_v29  ;;  %vm224_vm5 = vcmp.gt.f32.partialorder %v173_v34, 0.0 }
  0xda   :  { %v234_v43 = vmul.f32 0.2, %v216_v35  ;;  %v239_v45 = vsel %vm223_vm4, %v214_v31, %v231_v37  ;;  %v218_v47 = vadd.f32 %v217_v39, %v43_v29  ;;  %v299_v48 = vpack.c.bf16 %v237_v44, %v236_v40 }
  0xdb   :  { %v300_v49 = vpack.c.bf16 %v239_v45, %v238_v41  ;;  %vm226_vm6 = vcmp.gt.f32.partialorder %v216_v35, 0.0  ;;  %vm225_vm7 = vcmp.gt.f32.partialorder %v175_v46, 0.0  ;;  %v233_v50 = vmul.f32 0.2, %v175_v46 }
  0xdc   :  { %vm227_vm8 = vcmp.gt.f32.partialorder %v218_v47, 0.0  ;;  %v235_v51 = vmul.f32 0.2, %v218_v47  ;;  %268 = vst [vmem:[%s423_s3] sm:$0xff] %v299_v48  ;;  %v240_v52 = vsel %vm224_vm5, %v173_v34, %v232_v42  ;;  %v242_v53 = vsel %vm226_vm6, %v216_v35, %v234_v43 }
  0xdd   :  { %269 = vst [vmem:[%s423_s3 + $0x8] sm:$0xff] %v300_v49  ;;  %v241_v54 = vsel %vm225_vm7, %v175_v46, %v233_v50 }
  0xde   :  { %v243_v55 = vsel %vm227_vm8, %v218_v47, %v235_v51  ;;  %v301_v56 = vpack.c.bf16 %v241_v54, %v240_v52 }
  0xdf   :  { %v302_v57 = vpack.c.bf16 %v243_v55, %v242_v53 }
  0xe0   :  { %270 = vst [vmem:[%s423_s3 + $0x10] sm:$0xff] %v301_v56 }
  0xe1   :  { %271 = vst [vmem:[%s423_s3 + $0x18] sm:$0xff] %v302_v57 }

// kernel: nlayer_discriminator_forward.5
= control target key start
LH: loop header
LB: loop body
LE: loop exit
PB: predicated region body
PF: predicated region fallthrough
CT: control target
= control target key end

     0   :  { %v472_v48 = vmov 0   ;;  %s608_s1 = inlined_call_operand.vmem [shape: bf16[256,128], index: 1, kind: input, shape index: {}]   ;;  %s609_s0 = inlined_call_operand.vmem [shape: bf16[32,256], index: 0, kind: input, shape index: {}]   ;;  %s610_s3 = inlined_call_operand.vmem [shape: f32[32,1], index: 3, kind: input, shape index: {}]   ;;  %s611_s2 = inlined_call_operand.vmem [shape: f32[32,1], index: 2, kind: input, shape index: {}]   ;;  %s612_s4 = inlined_call_operand.vmem [shape: bf16[32,128], index: 4, kind: output, shape index: {}]  }
   0x1   :  { %v442_v0 = vld [vmem:[%s608_s1 + $0x78] sm:$0xff]   ;;  %v444_v2 = vld [vmem:[%s608_s1 + $0x70] sm:$0xff]   ;;  %v446_v4 = vld [vmem:[%s608_s1 + $0x68] sm:$0xff]   ;;  %441 = vset.pattern.permute.xlu1 %v472_v48  ;;  %440 = vset.pattern.permute.xlu0 %v472_v48 }
   0x2   :  { %v443_v1 = vld [vmem:[%s608_s1 + $0x38] sm:$0xff]   ;;  %395 = vmatprep.subr.bf16.mxu0 %v442_v0  ;;  %423 = vmatprep.subr.bf16.mxu1 %v442_v0  ;;  %v445_v3 = vld [vmem:[%s608_s1 + $0x30] sm:$0xff]   ;;  %v447_v5 = vld [vmem:[%s608_s1 + $0x28] sm:$0xff]  }
   0x3   :  { %396 = vmatpush3.bf16.msra.mxu0 %v443_v1  ;;  %431 = vmatpush3.bf16.msra.mxu1 %v443_v1  ;;  %v448_v6 = vld [vmem:[%s608_s1 + $0x60] sm:$0xff]   ;;  %v450_v8 = vld [vmem:[%s608_s1 + $0x58] sm:$0xff]   ;;  %v452_v10 = vld [vmem:[%s608_s1 + $0x50] sm:$0xff]  }
   0x4   :  { %397 = vmatprep.subr.bf16.mxu0 %v444_v2  ;;  %424 = vmatprep.subr.bf16.mxu1 %v444_v2  ;;  %v449_v7 = vld [vmem:[%s608_s1 + $0x20] sm:$0xff]   ;;  %v451_v9 = vld [vmem:[%s608_s1 + $0x18] sm:$0xff]   ;;  %v453_v13 = vld [vmem:[%s608_s1 + $0x10] sm:$0xff]  }
   0x5   :  { %v460_v11 = vld [vmem:[%s609_s0 + $0x4] ss:$8 sps:$4 sm:$0xff]   ;;  %v463_v12 = vld [vmem:[%s609_s0 + $0x14] ss:$8 sps:$4 sm:$0xff]   ;;  %v458_v18 = vld [vmem:[%s609_s0] ss:$8 sps:$4 sm:$0xff]  }
   0x6   :  { %v454_v14 = vld [vmem:[%s608_s1 + $0x48] sm:$0xff]   ;;  %202 = vmatprep.mubr.bf16.mxu0 %v460_v11  ;;  %210 = vmatprep.mubr.bf16.mxu1 %v463_v12  ;;  %v456_v16 = vld [vmem:[%s608_s1 + $0x40] sm:$0xff]   ;;  %v461_v19 = vld [vmem:[%s609_s0 + $0x10] ss:$8 sps:$4 sm:$0xff]  }
   0x7   :  { %398 = vmatpush3.bf16.msra.mxu0 %v445_v3  ;;  %432 = vmatpush3.bf16.msra.mxu1 %v445_v3  ;;  %v455_v15 = vld [vmem:[%s608_s1 + $0x8] sm:$0xff]   ;;  %v457_v17 = vld [vmem:[%s608_s1] sm:$0xff]   ;;  %v294_v51 = vld [vmem:[%s610_s3 + $0x10] sm:$0xff] }
   0x8   :  { %399 = vmatprep.subr.bf16.mxu0 %v446_v4  ;;  %425 = vmatprep.subr.bf16.mxu1 %v446_v4  ;;  %v292_v49 = vld [vmem:[%s610_s3] sm:$0xff]  ;;  %v293_v50 = vld [vmem:[%s610_s3 + $0x8] sm:$0xff]  ;;  %v254_v3 = vld [vmem:[%s611_s2 + $0x10] sm:$0xff] }
   0x9   :  { %v252_v0 = vld [vmem:[%s611_s2] sm:$0xff]  ;;  %v295_v12 = vld [vmem:[%s610_s3 + $0x18] sm:$0xff] }
   0xb   :  { %400 = vmatpush3.bf16.msra.mxu0 %v447_v5  ;;  %433 = vmatpush3.bf16.msra.mxu1 %v447_v5 }
   0xc   :  { %401 = vmatprep.subr.bf16.mxu0 %v448_v6  ;;  %426 = vmatprep.subr.bf16.mxu1 %v448_v6 }
   0xf   :  { %402 = vmatpush3.bf16.msra.mxu0 %v449_v7  ;;  %434 = vmatpush3.bf16.msra.mxu1 %v449_v7  ;;  %v253_v7 = vld [vmem:[%s611_s2 + $0x8] sm:$0xff] }
  0x10   :  { %403 = vmatprep.subr.bf16.mxu0 %v450_v8  ;;  %427 = vmatprep.subr.bf16.mxu1 %v450_v8 }
  0x13   :  { %404 = vmatpush3.bf16.msra.mxu0 %v451_v9  ;;  %435 = vmatpush3.bf16.msra.mxu1 %v451_v9 }
  0x14   :  { %405 = vmatprep.subr.bf16.mxu0 %v452_v10  ;;  %428 = vmatprep.subr.bf16.mxu1 %v452_v10  ;;  %v255_v10 = vld [vmem:[%s611_s2 + $0x18] sm:$0xff] }
  0x17   :  { %406 = vmatpush3.bf16.msra.mxu0 %v453_v13  ;;  %436 = vmatpush3.bf16.msra.mxu1 %v453_v13 }
  0x18   :  { %407 = vmatprep.subr.bf16.mxu0 %v454_v14  ;;  %429 = vmatprep.subr.bf16.mxu1 %v454_v14 }
  0x1b   :  { %408 = vmatpush3.bf16.msra.mxu0 %v455_v15  ;;  %437 = vmatpush3.bf16.msra.mxu1 %v455_v15 }
  0x1c   :  { %409 = vmatprep.subr.bf16.mxu0 %v456_v16  ;;  %430 = vmatprep.subr.bf16.mxu1 %v456_v16 }
  0x1f   :  { %410 = vmatpush3.bf16.msra.mxu0 %v457_v17  ;;  %438 = vmatpush3.bf16.msra.mxu1 %v457_v17 }
  0x22   :  { %203 = vmatmul.mubr.bf16.vlgmr.msra.gmra.mxu0 %v458_v18  ;;  %211 = vmatmul.mubr.bf16.vlgmr.msra.gmra.mxu1 %v461_v19 }
  0xe2   :  { %v411_v20 = vpop.f32.mrf.mxu0  ;;  %v417_v21 = vpop.f32.mrf.mxu1 }
  0xe4   :  { %v412_v22 = vpop.f32.mrf.mxu0  ;;  %v418_v23 = vpop.f32.mrf.mxu1 }
  0xe5   :  { %v413_v24 = vadd.f32 %v412_v22, %v411_v20  ;;  %v419_v25 = vadd.f32 %v418_v23, %v417_v21 }
  0xe6   :  { %v414_v26 = vpop.f32.mrf.mxu0  ;;  %v420_v27 = vpop.f32.mrf.mxu1 }
  0xe7   :  { %223 = vadd.xlane.f32.xlu1 %v419_v25  ;;  %219 = vadd.xlane.f32.xlu0 %v413_v24 }
  0xe8   :  { %v415_v28 = vpop.f32.mrf.mxu0  ;;  %v421_v29 = vpop.f32.mrf.mxu1 }
  0xe9   :  { %v416_v30 = vadd.f32 %v415_v28, %v414_v26  ;;  %v422_v31 = vadd.f32 %v421_v29, %v420_v27 }
  0xeb   :  { %225 = vadd.xlane.f32.xlu1 %v422_v31  ;;  %221 = vadd.xlane.f32.xlu0 %v416_v30 }
 0x170   :  { %v224_v32 = vpop.xlane.xlu1 %223  ;;  %v220_v33 = vpop.xlane.xlu0 %219 }
 0x171   :  { %v230_v34 = vmul.f32 0.0078125, %v224_v32  ;;  %v228_v35 = vmul.f32 0.0078125, %v220_v33 }
 0x173   :  { %v558_v36 = vsub.f32 %v413_v24, %v228_v35  ;;  %v560_v39 = vsub.f32 %v419_v25, %v230_v34 }
 0x174   :  { %v226_v37 = vpop.xlane.xlu1 %225  ;;  %v222_v38 = vpop.xlane.xlu0 %221 }
 0x175   :  { %v231_v40 = vmul.f32 0.0078125, %v226_v37  ;;  %v229_v41 = vmul.f32 0.0078125, %v222_v38  ;;  %v236_v42 = vmul.f32 %v558_v36, %v558_v36  ;;  %v238_v45 = vmul.f32 %v560_v39, %v560_v39 }
 0x177   :  { %v564_v43 = vsub.f32 %v416_v30, %v229_v41  ;;  %240 = vadd.xlane.f32.xlu0 %v236_v42  ;;  %v566_v44 = vsub.f32 %v422_v31, %v231_v40 }
 0x179   :  { %v237_v46 = vmul.f32 %v564_v43, %v564_v43  ;;  %v239_v47 = vmul.f32 %v566_v44, %v566_v44 }
 0x17b   :  { %244 = vadd.xlane.f32.xlu0 %v238_v45  ;;  %242 = vadd.xlane.f32.xlu1 %v237_v46 }
 0x17f   :  { %246 = vadd.xlane.f32.xlu1 %v239_v47 }
 0x190   :  { %298 = vperm.xlu1 %441, %v292_v49  }
 0x194   :  { %303 = vperm.xlu1 %441, %v293_v50  }
 0x198   :  { %308 = vperm.xlu1 %441, %v294_v51  }
 0x200   :  { %v241_v52 = vpop.xlane.xlu0 %240 }
 0x201   :  { %v248_v53 = vmul.f32 0.0078125, %v241_v52 }
 0x203   :  { %v256_v54 = vadd.f32 1e-05, %v248_v53 }
 0x204   :  { %v243_v55 = vpop.xlane.xlu1 %242  ;;  %v245_v56 = vpop.xlane.xlu0 %244 }
 0x205   :  { %464 = vrsqrt.f32 %v256_v54  ;;  %v249_v57 = vmul.f32 0.0078125, %v243_v55  ;;  %v250_v58 = vmul.f32 0.0078125, %v245_v56 }
 0x207   :  { %v258_v59 = vadd.f32 1e-05, %v250_v58  ;;  %v257_v60 = vadd.f32 1e-05, %v249_v57 }
 0x208   :  { %v247_v61 = vpop.xlane.xlu1 %246 }
 0x209   :  { %v251_v62 = vmul.f32 0.0078125, %v247_v61  ;;  %466 = vrsqrt.f32 %v258_v59 }
 0x20a   :  { %468 = vrsqrt.f32 %v257_v60 }
 0x20b   :  { %v259_v63 = vadd.f32 1e-05, %v251_v62 }
 0x20c   :  { %v299_v13 = vpop.permute.xlu1 %298 }
 0x20d   :  { %470 = vrsqrt.f32 %v259_v63 }
 0x210   :  { %v304_v14 = vpop.permute.xlu1 %303 }
 0x212   :  { %v465_v1 = vpop.eup %464 }
 0x213   :  { %v264_v2 = vmul.f32 %v465_v1, %v252_v0 }
 0x214   :  { %v309_v15 = vpop.permute.xlu1 %308 }
 0x215   :  { %270 = vperm.xlu0 %440, %v264_v2  }
 0x216   :  { %v467_v4 = vpop.eup %466 }
 0x217   :  { %v266_v5 = vmul.f32 %v467_v4, %v254_v3  ;;  %v469_v6 = vpop.eup %468 }
 0x218   :  { %v265_v8 = vmul.f32 %v469_v6, %v253_v7 }
 0x219   :  { %280 = vperm.xlu1 %441, %v266_v5  }
 0x21a   :  { %v471_v9 = vpop.eup %470 }
 0x21b   :  { %v267_v11 = vmul.f32 %v471_v9, %v255_v10 }
 0x21d   :  { %275 = vperm.xlu1 %441, %v265_v8  }
 0x221   :  { %285 = vperm.xlu1 %441, %v267_v11  }
 0x225   :  { %313 = vperm.xlu1 %441, %v295_v12  }
 0x290   :  { %v271_v16 = vpop.permute.xlu0 %270 }
 0x291   :  { %v288_v17 = vmul.f32 %v271_v16, %v558_v36 }
 0x293   :  { %v316_v19 = vadd.f32 %v299_v13, %v288_v17 }
 0x294   :  { %v281_v18 = vpop.permute.xlu1 %280 }
 0x295   :  { %v290_v21 = vmul.f32 %v281_v18, %v560_v39  ;;  %v324_v23 = vmul.f32 0.2, %v316_v19  ;;  %vm320_vm0 = vcmp.gt.f32.partialorder %v316_v19, 0.0 }
 0x297   :  { %v318_v26 = vadd.f32 %v309_v15, %v290_v21  ;;  %v328_v28 = vsel %vm320_vm0, %v316_v19, %v324_v23 }
 0x298   :  { %v276_v20 = vpop.permute.xlu1 %275 }
 0x299   :  { %v289_v22 = vmul.f32 %v276_v20, %v564_v43  ;;  %v326_v33 = vmul.f32 0.2, %v318_v26  ;;  %vm322_vm2 = vcmp.gt.f32.partialorder %v318_v26, 0.0 }
 0x29b   :  { %v317_v24 = vadd.f32 %v304_v14, %v289_v22  ;;  %v330_v36 = vsel %vm322_vm2, %v318_v26, %v326_v33 }
 0x29c   :  { %v286_v25 = vpop.permute.xlu1 %285 }
 0x29d   :  { %vm321_vm1 = vcmp.gt.f32.partialorder %v317_v24, 0.0  ;;  %v325_v27 = vmul.f32 0.2, %v317_v24  ;;  %v291_v30 = vmul.f32 %v286_v25, %v566_v44 }
 0x29f   :  { %v329_v29 = vsel %vm321_vm1, %v317_v24, %v325_v27 }
 0x2a0   :  { %v387_v31 = vpack.c.bf16 %v329_v29, %v328_v28  ;;  %v314_v32 = vpop.permute.xlu1 %313 }
 0x2a1   :  { %v319_v34 = vadd.f32 %v314_v32, %v291_v30 }
 0x2a2   :  { %388 = vst [vmem:[%s612_s4] sm:$0xff] %v387_v31  }
 0x2a3   :  { %vm323_vm3 = vcmp.gt.f32.partialorder %v319_v34, 0.0  ;;  %v327_v35 = vmul.f32 0.2, %v319_v34 }
 0x2a5   :  { %v331_v37 = vsel %vm323_vm3, %v319_v34, %v327_v35 }
 0x2a6   :  { %v392_v38 = vpack.c.bf16 %v331_v37, %v330_v36 }
 0x2a8   :  { %394 = vst [vmem:[%s612_s4 + $0x8] sm:$0xff] %v392_v38  }

// kernel: nlayer_discriminator_forward.6
= control target key start
LH: loop header
LB: loop body
LE: loop exit
PB: predicated region body
PF: predicated region fallthrough
CT: control target
= control target key end

     0   :  { %vm420_vm0 = vcmask 523264   ;;  %vm511_vm5 = vcmask 519168   ;;  %s842_s1 = inlined_call_operand.vmem [shape: bf16[512,64], index: 1, kind: input, shape index: {}]   ;;  %s843_s0 = inlined_call_operand.vmem [shape: bf16[32,512], index: 0, kind: input, shape index: {}]   ;;  %s844_s2 = inlined_call_operand.vmem [shape: f32[1,64], index: 2, kind: input, shape index: {}]   ;;  %s845_s3 = inlined_call_operand.vmem [shape: f32[1,64], index: 3, kind: input, shape index: {}]   ;;  %s846_s4 = inlined_call_operand.vmem [shape: bf16[32,64], index: 4, kind: output, shape index: {}]  }
   0x1   :  { %v625_v0 = vld [vmem:[%s842_s1 + $0x78] sm:$0xff]   ;;  %v629_v4 = vld [vmem:[%s842_s1 + $0x70] sm:$0xff]   ;;  %v633_v8 = vld [vmem:[%s842_s1 + $0x68] sm:$0xff]  }
   0x2   :  { %v626_v1 = vld [vmem:[%s842_s1 + $0xf8] sm:$0xff]   ;;  %569 = vmatprep.subr.bf16.mxu0 %v625_v0  ;;  %v630_v5 = vld [vmem:[%s842_s1 + $0xf0] sm:$0xff]   ;;  %v634_v9 = vld [vmem:[%s842_s1 + $0xe8] sm:$0xff]  }
   0x3   :  { %v627_v2 = vld [vmem:[%s842_s1 + $0x38] sm:$0xff]   ;;  %597 = vmatprep.subr.bf16.mxu1 %v626_v1  ;;  %v631_v6 = vld [vmem:[%s842_s1 + $0x30] sm:$0xff]   ;;  %v635_v10 = vld [vmem:[%s842_s1 + $0x28] sm:$0xff]  }
   0x4   :  { %v628_v3 = vld [vmem:[%s842_s1 + $0xb8] sm:$0xff]   ;;  %570 = vmatpush3.bf16.msra.mxu0 %v627_v2  ;;  %v632_v7 = vld [vmem:[%s842_s1 + $0xb0] sm:$0xff]   ;;  %v636_v11 = vld [vmem:[%s842_s1 + $0xa8] sm:$0xff]  }
   0x5   :  { %598 = vmatpush3.bf16.msra.mxu1 %v628_v3  ;;  %571 = vmatprep.subr.bf16.mxu0 %v629_v4  ;;  %v637_v12 = vld [vmem:[%s842_s1 + $0x60] sm:$0xff]   ;;  %v641_v16 = vld [vmem:[%s842_s1 + $0x58] sm:$0xff]   ;;  %v645_v20 = vld [vmem:[%s842_s1 + $0x50] sm:$0xff]  }
   0x6   :  { %599 = vmatprep.subr.bf16.mxu1 %v630_v5  ;;  %v638_v13 = vld [vmem:[%s842_s1 + $0xe0] sm:$0xff]   ;;  %v642_v17 = vld [vmem:[%s842_s1 + $0xd8] sm:$0xff]   ;;  %v646_v21 = vld [vmem:[%s842_s1 + $0xd0] sm:$0xff]  }
   0x7   :  { %v639_v14 = vld [vmem:[%s842_s1 + $0x20] sm:$0xff]   ;;  %v643_v18 = vld [vmem:[%s842_s1 + $0x18] sm:$0xff]   ;;  %v647_v22 = vld [vmem:[%s842_s1 + $0x10] sm:$0xff]  }
   0x8   :  { %572 = vmatpush3.bf16.msra.mxu0 %v631_v6  ;;  %v640_v15 = vld [vmem:[%s842_s1 + $0xa0] sm:$0xff]   ;;  %v644_v19 = vld [vmem:[%s842_s1 + $0x98] sm:$0xff]   ;;  %v648_v23 = vld [vmem:[%s842_s1 + $0x90] sm:$0xff]  }
   0x9   :  { %600 = vmatpush3.bf16.msra.mxu1 %v632_v7  ;;  %573 = vmatprep.subr.bf16.mxu0 %v633_v8  ;;  %v649_v24 = vld [vmem:[%s842_s1 + $0x48] sm:$0xff]   ;;  %v653_v28 = vld [vmem:[%s842_s1 + $0x40] sm:$0xff]  }
   0xa   :  { %601 = vmatprep.subr.bf16.mxu1 %v634_v9  ;;  %v650_v25 = vld [vmem:[%s842_s1 + $0xc8] sm:$0xff]   ;;  %v654_v29 = vld [vmem:[%s842_s1 + $0xc0] sm:$0xff]  }
   0xb   :  { %v651_v26 = vld [vmem:[%s842_s1 + $0x8] sm:$0xff]   ;;  %v655_v30 = vld [vmem:[%s842_s1] sm:$0xff]  }
   0xc   :  { %574 = vmatpush3.bf16.msra.mxu0 %v635_v10  ;;  %v652_v27 = vld [vmem:[%s842_s1 + $0x88] sm:$0xff]   ;;  %v656_v31 = vld [vmem:[%s842_s1 + $0x80] sm:$0xff]  }
   0xd   :  { %602 = vmatpush3.bf16.msra.mxu1 %v636_v11  ;;  %575 = vmatprep.subr.bf16.mxu0 %v637_v12  ;;  %v657_v32 = vld [vmem:[%s843_s0] ss:$16 sps:$4 sm:$0xff]   ;;  %v659_v33 = vld [vmem:[%s843_s0 + $0x4] ss:$16 sps:$4 sm:$0xff]   ;;  %v660_v34 = vld [vmem:[%s843_s0 + $0x8] ss:$16 sps:$4 sm:$0xff]  }
   0xe   :  { %603 = vmatprep.subr.bf16.mxu1 %v638_v13  ;;  %v662_v35 = vld [vmem:[%s843_s0 + $0xc] ss:$16 sps:$4 sm:$0xff]   ;;  %354 = vmatprep.mubr.bf16.mxu0 %v659_v33  ;;  %v663_v36 = vld [vmem:[%s843_s0 + $0x24] ss:$16 sps:$4 sm:$0xff]   ;;  %v667_v38 = vld [vmem:[%s843_s0 + $0x20] ss:$16 sps:$4 sm:$0xff]  }
   0xf   :  { %403 = vmatprep.mubr.bf16.mxu1 %v662_v35  ;;  %v665_v37 = vld [vmem:[%s843_s0 + $0x2c] ss:$16 sps:$4 sm:$0xff]   ;;  %v668_v39 = vld [vmem:[%s843_s0 + $0x28] ss:$16 sps:$4 sm:$0xff]  }
  0x10   :  { %576 = vmatpush3.bf16.msra.mxu0 %v639_v14 }
  0x11   :  { %604 = vmatpush3.bf16.msra.mxu1 %v640_v15  ;;  %577 = vmatprep.subr.bf16.mxu0 %v641_v16 }
  0x12   :  { %605 = vmatprep.subr.bf16.mxu1 %v642_v17 }
  0x14   :  { %578 = vmatpush3.bf16.msra.mxu0 %v643_v18 }
  0x15   :  { %606 = vmatpush3.bf16.msra.mxu1 %v644_v19  ;;  %579 = vmatprep.subr.bf16.mxu0 %v645_v20 }
  0x16   :  { %607 = vmatprep.subr.bf16.mxu1 %v646_v21 }
  0x18   :  { %580 = vmatpush3.bf16.msra.mxu0 %v647_v22 }
  0x19   :  { %608 = vmatpush3.bf16.msra.mxu1 %v648_v23  ;;  %581 = vmatprep.subr.bf16.mxu0 %v649_v24 }
  0x1a   :  { %609 = vmatprep.subr.bf16.mxu1 %v650_v25 }
  0x1c   :  { %582 = vmatpush3.bf16.msra.mxu0 %v651_v26 }
  0x1d   :  { %610 = vmatpush3.bf16.msra.mxu1 %v652_v27  ;;  %583 = vmatprep.subr.bf16.mxu0 %v653_v28 }
  0x1e   :  { %611 = vmatprep.subr.bf16.mxu1 %v654_v29 }
  0x20   :  { %584 = vmatpush3.bf16.msra.mxu0 %v655_v30 }
  0x21   :  { %612 = vmatpush3.bf16.msra.mxu1 %v656_v31 }
  0x23   :  { %355 = vmatmul.mubr.bf16.vlgmr.msra.gmra.mxu0 %v657_v32 }
  0x24   :  { %404 = vmatmul.mubr.bf16.vlgmr.msra.gmra.mxu1 %v660_v34  ;;  %362 = vmatprep.mubr.bf16.mxu0 %v663_v36 }
  0x25   :  { %411 = vmatprep.mubr.bf16.mxu1 %v665_v37 }
  0x2b   :  { %363 = vmatmul.mubr.bf16.gmra.mxu0 %v667_v38 }
  0x2c   :  { %412 = vmatmul.mubr.bf16.gmra.mxu1 %v668_v39 }
  0xe3   :  { %v585_v40 = vpop.f32.mrf.mxu0 }
  0xe4   :  { %v613_v41 = vpop.f32.mrf.mxu1 }
  0xe5   :  { %v586_v42 = vpop.f32.mrf.mxu0 }
  0xe6   :  { %v614_v43 = vpop.f32.mrf.mxu1  ;;  %v587_v49 = vadd.f32 %v586_v42, %v585_v40 }
  0xe7   :  { %v588_v44 = vpop.f32.mrf.mxu0  ;;  %v615_v50 = vadd.f32 %v614_v43, %v613_v41  ;;  %v463_v41 = vlaneseq  ;;  %v458_v43 = vld [vmem:[%s844_s2] sm:$0x1] }
  0xe8   :  { %v616_v45 = vpop.f32.mrf.mxu1 }
  0xe9   :  { %v589_v46 = vpop.f32.mrf.mxu0  ;;  %v406_v58 = vadd.f32 %v615_v50, %v587_v49  ;;  %v464_v42 = vshrl.u32 %v463_v41, 7 }
  0xea   :  { %v590_v47 = vadd.f32 %v589_v46, %v588_v44  ;;  %v617_v48 = vpop.f32.mrf.mxu1 }
  0xeb   :  { %v618_v51 = vadd.f32 %v617_v48, %v616_v45  ;;  %v591_v52 = vpop.f32.mrf.mxu0  ;;  %v421_v3 = vsel %vm420_vm0, %v406_v58, 0.0  ;;  %v465_v44 = vsub.s32 0, %v464_v42  ;;  %v560_v48 = vld [vmem:[%s845_s3] ss:$0 sm:$0xff] }
  0xec   :  { %v619_v53 = vpop.f32.mrf.mxu1 }
  0xed   :  { %v409_v54 = vadd.f32 %v618_v51, %v590_v47  ;;  %v592_v55 = vpop.f32.mrf.mxu0 }
  0xee   :  { %v593_v56 = vadd.f32 %v592_v55, %v591_v52  ;;  %v620_v57 = vpop.f32.mrf.mxu1 }
  0xef   :  { %v621_v59 = vadd.f32 %v620_v57, %v619_v53  ;;  %v594_v60 = vpop.f32.mrf.mxu0  ;;  %v422_v62 = vsel %vm420_vm0, %v409_v54, 0.0 }
  0xf0   :  { %v622_v61 = vpop.f32.mrf.mxu1  ;;  %v423_v6 = vadd.f32 %v422_v62, %v421_v3 }
  0xf1   :  { %v414_v63 = vadd.f32 %v621_v59, %v593_v56  ;;  %v595_v0 = vpop.f32.mrf.mxu0 }
  0xf2   :  { %v596_v1 = vadd.f32 %v595_v0, %v594_v60  ;;  %v623_v2 = vpop.f32.mrf.mxu1 }
  0xf3   :  { %v424_v4 = vsel %vm420_vm0, %v414_v63, 0.0  ;;  %v624_v5 = vadd.f32 %v623_v2, %v622_v61 }
  0xf4   :  { %v425_v8 = vadd.f32 %v424_v4, %v423_v6 }
  0xf5   :  { %v417_v7 = vadd.f32 %v624_v5, %v596_v1 }
  0xf7   :  { %v426_v9 = vsel %vm420_vm0, %v417_v7, 0.0 }
  0xf8   :  { %v427_v10 = vadd.f32 %v426_v9, %v425_v8 }
  0xfa   :  { %v428_v11 = vrot.slane %v427_v10, 4 }
  0xfc   :  { %v429_v12 = vadd.f32 %v428_v11, %v427_v10 }
  0xfe   :  { %v430_v13 = vrot.slane %v429_v12, 2 }
 0x100   :  { %v431_v14 = vadd.f32 %v430_v13, %v429_v12 }
 0x102   :  { %v432_v15 = vrot.slane %v431_v14, 1 }
 0x104   :  { %v433_v16 = vadd.f32 %v432_v15, %v431_v14 }
 0x106   :  { %v435_v17 = vmul.f32 0.03125, %v433_v16 }
 0x108   :  { %v436_v18 = vsub.f32 %v406_v58, %v435_v17  ;;  %v437_v19 = vsub.f32 %v409_v54, %v435_v17  ;;  %v438_v20 = vsub.f32 %v414_v63, %v435_v17  ;;  %v439_v21 = vsub.f32 %v417_v7, %v435_v17 }
 0x10a   :  { %v440_v22 = vmul.f32 %v436_v18, %v436_v18  ;;  %v441_v23 = vmul.f32 %v437_v19, %v437_v19  ;;  %v442_v24 = vmul.f32 %v438_v20, %v438_v20  ;;  %v443_v25 = vmul.f32 %v439_v21, %v439_v21 }
 0x10c   :  { %v444_v26 = vsel %vm420_vm0, %v440_v22, 0.0  ;;  %v445_v27 = vsel %vm420_vm0, %v441_v23, 0.0  ;;  %v447_v29 = vsel %vm420_vm0, %v442_v24, 0.0  ;;  %v449_v31 = vsel %vm420_vm0, %v443_v25, 0.0 }
 0x10d   :  { %v446_v28 = vadd.f32 %v445_v27, %v444_v26 }
 0x10f   :  { %v448_v30 = vadd.f32 %v447_v29, %v446_v28 }
 0x111   :  { %v450_v32 = vadd.f32 %v449_v31, %v448_v30 }
 0x113   :  { %v451_v33 = vrot.slane %v450_v32, 4 }
 0x115   :  { %v452_v34 = vadd.f32 %v451_v33, %v450_v32 }
 0x117   :  { %v453_v35 = vrot.slane %v452_v34, 2 }
 0x119   :  { %v454_v36 = vadd.f32 %v453_v35, %v452_v34 }
 0x11b   :  { %v455_v37 = vrot.slane %v454_v36, 1 }
 0x11d   :  { %v456_v38 = vadd.f32 %v455_v37, %v454_v36 }
 0x11f   :  { %v457_v39 = vmul.f32 0.03125, %v456_v38 }
 0x121   :  { %v459_v40 = vadd.f32 1e-05, %v457_v39 }
 0x123   :  { %669 = vrsqrt.f32 %v459_v40 }
 0x130   :  { %v670_v45 = vpop.eup %669 }
 0x131   :  { %v461_v46 = vmul.f32 %v670_v45, %v458_v43 }
 0x133   :  { %v466_v47 = vrot.slane %v461_v46, %v465_v44 }
 0x135   :  { %v468_v49 = vmul.f32 %v466_v47, %v436_v18  ;;  %v469_v50 = vmul.f32 %v466_v47, %v437_v19  ;;  %v470_v51 = vmul.f32 %v466_v47, %v438_v20  ;;  %v471_v52 = vmul.f32 %v466_v47, %v439_v21 }
 0x137   :  { %v479_v53 = vadd.f32 %v560_v48, %v468_v49  ;;  %v480_v54 = vadd.f32 %v560_v48, %v469_v50  ;;  %v481_v55 = vadd.f32 %v560_v48, %v470_v51  ;;  %v482_v56 = vadd.f32 %v560_v48, %v471_v52 }
 0x139   :  { %vm483_vm1 = vcmp.gt.f32.partialorder %v479_v53, 0.0  ;;  %vm484_vm2 = vcmp.gt.f32.partialorder %v480_v54, 0.0  ;;  %vm485_vm3 = vcmp.gt.f32.partialorder %v481_v55, 0.0  ;;  %vm486_vm4 = vcmp.gt.f32.partialorder %v482_v56, 0.0 }
 0x13a   :  { %v487_v57 = vmul.f32 0.2, %v479_v53  ;;  %v488_v58 = vmul.f32 0.2, %v480_v54  ;;  %v489_v59 = vmul.f32 0.2, %v481_v55 }
 0x13b   :  { %v490_v60 = vmul.f32 0.2, %v482_v56 }
 0x13c   :  { %v491_v61 = vsel %vm483_vm1, %v479_v53, %v487_v57  ;;  %v492_v62 = vsel %vm484_vm2, %v480_v54, %v488_v58  ;;  %v493_v63 = vsel %vm485_vm3, %v481_v55, %v489_v59 }
 0x13d   :  { %v494_v0 = vsel %vm486_vm4, %v482_v56, %v490_v60  ;;  %v565_v1 = vpack.c.bf16 %v491_v61, %v491_v61  ;;  %v566_v2 = vpack.c.bf16 %v492_v62, %v492_v62  ;;  %v567_v3 = vpack.c.bf16 %v493_v63, %v493_v63 }
 0x13e   :  { %v568_v4 = vpack.c.bf16 %v494_v0, %v494_v0 }
 0x13f   :  { %512 = vst.msk [vmem:[%s846_s4] sm:$0xf] %vm511_vm5, %v565_v1  ;;  %513 = vst.msk [vmem:[%s846_s4 + $0x4] sm:$0xf] %vm511_vm5, %v566_v2 }
 0x140   :  { %514 = vst.msk [vmem:[%s846_s4 + $0x8] sm:$0xf] %vm511_vm5, %v567_v3  ;;  %515 = vst.msk [vmem:[%s846_s4 + $0xc] sm:$0xf] %vm511_vm5, %v568_v4 }

// kernel: nlayer_discriminator_forward.7
= control target key start
LH: loop header
LB: loop body
LE: loop exit
PB: predicated region body
PF: predicated region fallthrough
CT: control target
= control target key end

     0   :  { %vm811_vm0 = vcmask 1041408   ;;  %vm941_vm4 = vcmask 1043456   ;;  %vm963_vm5 = vcmask 3072   ;;  %s1702_s1 = inlined_call_operand.vmem [shape: bf16[1024,128], index: 1, kind: input, shape index: {}]   ;;  %s1703_s0 = inlined_call_operand.vmem [shape: bf16[18,1024], index: 0, kind: input, shape index: {}]   ;;  %s1704_s5 = inlined_call_operand.<no memory space> [shape: f32[1,1], index: 5, kind: input, shape index: {}]   ;;  %s1705_s2 = inlined_call_operand.vmem [shape: f32[1,128], index: 2, kind: input, shape index: {}]   ;;  %s1706_s3 = inlined_call_operand.vmem [shape: f32[1,128], index: 3, kind: input, shape index: {}]   ;;  %s1707_s4 = inlined_call_operand.vmem [shape: f32[9,4,128], index: 4, kind: input, shape index: {}]   ;;  %s1708_s6 = inlined_call_operand.vmem [shape: f32[8,1], index: 6, kind: output, shape index: {}]  }
   0x1   :  { %v1265_v0 = vld [vmem:[%s1702_s1 + $0x78] sm:$0xff]   ;;  %v1269_v4 = vld [vmem:[%s1702_s1 + $0x70] sm:$0xff]   ;;  %v1273_v8 = vld [vmem:[%s1702_s1 + $0x68] sm:$0xff]  }
   0x2   :  { %v1266_v1 = vld [vmem:[%s1702_s1 + $0xf8] sm:$0xff]   ;;  %1153 = vmatprep.subr.bf16.mxu0 %v1265_v0  ;;  %v1270_v5 = vld [vmem:[%s1702_s1 + $0xf0] sm:$0xff]   ;;  %v1274_v9 = vld [vmem:[%s1702_s1 + $0xe8] sm:$0xff]  }
   0x3   :  { %v1267_v2 = vld [vmem:[%s1702_s1 + $0x38] sm:$0xff]   ;;  %1181 = vmatprep.subr.bf16.mxu1 %v1266_v1  ;;  %v1271_v6 = vld [vmem:[%s1702_s1 + $0x30] sm:$0xff]   ;;  %v1275_v10 = vld [vmem:[%s1702_s1 + $0x28] sm:$0xff]  }
   0x4   :  { %v1268_v3 = vld [vmem:[%s1702_s1 + $0xb8] sm:$0xff]   ;;  %1154 = vmatpush3.bf16.msra.mxu0 %v1267_v2  ;;  %v1272_v7 = vld [vmem:[%s1702_s1 + $0xb0] sm:$0xff]   ;;  %v1276_v11 = vld [vmem:[%s1702_s1 + $0xa8] sm:$0xff]  }
   0x5   :  { %1182 = vmatpush3.bf16.msra.mxu1 %v1268_v3  ;;  %1155 = vmatprep.subr.bf16.mxu0 %v1269_v4  ;;  %v1277_v12 = vld [vmem:[%s1702_s1 + $0x60] sm:$0xff]   ;;  %v1281_v16 = vld [vmem:[%s1702_s1 + $0x58] sm:$0xff]   ;;  %v1285_v20 = vld [vmem:[%s1702_s1 + $0x50] sm:$0xff]  }
   0x6   :  { %1183 = vmatprep.subr.bf16.mxu1 %v1270_v5  ;;  %v1278_v13 = vld [vmem:[%s1702_s1 + $0xe0] sm:$0xff]   ;;  %v1282_v17 = vld [vmem:[%s1702_s1 + $0xd8] sm:$0xff]   ;;  %v1286_v21 = vld [vmem:[%s1702_s1 + $0xd0] sm:$0xff]  }
   0x7   :  { %v1279_v14 = vld [vmem:[%s1702_s1 + $0x20] sm:$0xff]   ;;  %v1283_v18 = vld [vmem:[%s1702_s1 + $0x18] sm:$0xff]   ;;  %v1287_v22 = vld [vmem:[%s1702_s1 + $0x10] sm:$0xff]  }
   0x8   :  { %1156 = vmatpush3.bf16.msra.mxu0 %v1271_v6  ;;  %v1280_v15 = vld [vmem:[%s1702_s1 + $0xa0] sm:$0xff]   ;;  %v1284_v19 = vld [vmem:[%s1702_s1 + $0x98] sm:$0xff]   ;;  %v1288_v23 = vld [vmem:[%s1702_s1 + $0x90] sm:$0xff]  }
   0x9   :  { %1184 = vmatpush3.bf16.msra.mxu1 %v1272_v7  ;;  %1157 = vmatprep.subr.bf16.mxu0 %v1273_v8  ;;  %v1289_v24 = vld [vmem:[%s1702_s1 + $0x48] sm:$0xff]   ;;  %v1293_v28 = vld [vmem:[%s1702_s1 + $0x40] sm:$0xff]   ;;  %v1297_v40 = vld [vmem:[%s1702_s1 + $0x178] sm:$0xff]  }
   0xa   :  { %1185 = vmatprep.subr.bf16.mxu1 %v1274_v9  ;;  %v1290_v25 = vld [vmem:[%s1702_s1 + $0xc8] sm:$0xff]   ;;  %v1294_v29 = vld [vmem:[%s1702_s1 + $0xc0] sm:$0xff]   ;;  %v1298_v41 = vld [vmem:[%s1702_s1 + $0x1f8] sm:$0xff]  }
   0xb   :  { %v1291_v26 = vld [vmem:[%s1702_s1 + $0x8] sm:$0xff]   ;;  %v1295_v30 = vld [vmem:[%s1702_s1] sm:$0xff]   ;;  %v1299_v42 = vld [vmem:[%s1702_s1 + $0x138] sm:$0xff]  }
   0xc   :  { %1158 = vmatpush3.bf16.msra.mxu0 %v1275_v10  ;;  %v1292_v27 = vld [vmem:[%s1702_s1 + $0x88] sm:$0xff]   ;;  %v1296_v31 = vld [vmem:[%s1702_s1 + $0x80] sm:$0xff]   ;;  %v1300_v43 = vld [vmem:[%s1702_s1 + $0x1b8] sm:$0xff]  }
   0xd   :  { %1186 = vmatpush3.bf16.msra.mxu1 %v1276_v11  ;;  %1159 = vmatprep.subr.bf16.mxu0 %v1277_v12  ;;  %v26_v32 = vld [vmem:[%s1703_s0] sm:$0xff]  ;;  %v27_v34 = vld [vmem:[%s1703_s0 + $0x8] sm:$0xff]  ;;  %v1301_v44 = vld [vmem:[%s1702_s1 + $0x170] sm:$0xff]  }
   0xe   :  { %1187 = vmatprep.subr.bf16.mxu1 %v1278_v13  ;;  %v30_v33 = vld [vmem:[%s1703_s0 + $0x20] sm:$0xff]  ;;  %v31_v37 = vld [vmem:[%s1703_s0 + $0x28] sm:$0xff]  ;;  %v1302_v45 = vld [vmem:[%s1702_s1 + $0x1f0] sm:$0xff]  }
   0xf   :  { %v1054_v35 = vcombine.low %v26_v32, %v30_v33  ;;  %v1055_v36 = vcombine.high %v26_v32, %v30_v33  ;;  %v1056_v38 = vcombine.low %v27_v34, %v31_v37  ;;  %v1057_v39 = vcombine.high %v27_v34, %v31_v37  ;;  %v1303_v46 = vld [vmem:[%s1702_s1 + $0x130] sm:$0xff]   ;;  %v1305_v48 = vld [vmem:[%s1702_s1 + $0x168] sm:$0xff]   ;;  %v1309_v52 = vld [vmem:[%s1702_s1 + $0x160] sm:$0xff]  }
  0x10   :  { %1160 = vmatpush3.bf16.msra.mxu0 %v1279_v14  ;;  %v1304_v47 = vld [vmem:[%s1702_s1 + $0x1b0] sm:$0xff]   ;;  %v1306_v49 = vld [vmem:[%s1702_s1 + $0x1e8] sm:$0xff]   ;;  %v1310_v53 = vld [vmem:[%s1702_s1 + $0x1e0] sm:$0xff]   ;;  %v11_v34 = vstv %s1704_s5 }
  0x11   :  { %1188 = vmatpush3.bf16.msra.mxu1 %v1280_v15  ;;  %1161 = vmatprep.subr.bf16.mxu0 %v1281_v16  ;;  %v1307_v50 = vld [vmem:[%s1702_s1 + $0x128] sm:$0xff]   ;;  %v1311_v54 = vld [vmem:[%s1702_s1 + $0x120] sm:$0xff]   ;;  %v1313_v56 = vld [vmem:[%s1702_s1 + $0x158] sm:$0xff]   ;;  %12 = vst [vmem:[#allocation2] sm:$0x1] %v11_v34 }
  0x12   :  { %1189 = vmatprep.subr.bf16.mxu1 %v1282_v17  ;;  %650 = vmatprep.mubr.bf16.mxu0 %v1055_v36  ;;  %v1308_v51 = vld [vmem:[%s1702_s1 + $0x1a8] sm:$0xff]   ;;  %v1312_v55 = vld [vmem:[%s1702_s1 + $0x1a0] sm:$0xff]   ;;  %v1314_v57 = vld [vmem:[%s1702_s1 + $0x1d8] sm:$0xff]  }
  0x13   :  { %698 = vmatprep.mubr.bf16.mxu1 %v1057_v39  ;;  %v34_v58 = vld [vmem:[%s1703_s0 + $0x40] sm:$0x11]  ;;  %v1316_v60 = vld [vmem:[%s1702_s1 + $0x118] sm:$0xff]   ;;  %v35_v63 = vld [vmem:[%s1703_s0 + $0x48] sm:$0x11] }
  0x14   :  { %1162 = vmatpush3.bf16.msra.mxu0 %v1283_v18  ;;  %v1063_v59 = vcombine.high %v34_v58, %v34_v58  ;;  %v1062_v61 = vcombine.low %v34_v58, %v34_v58  ;;  %v1317_v62 = vld [vmem:[%s1702_s1 + $0x198] sm:$0xff]   ;;  %v1065_v0 = vcombine.high %v35_v63, %v35_v63  ;;  %v1064_v1 = vcombine.low %v35_v63, %v35_v63  ;;  %v1321_v2 = vld [vmem:[%s1702_s1 + $0x150] sm:$0xff]   ;;  %v1325_v6 = vld [vmem:[%s1702_s1 + $0x148] sm:$0xff]  }
  0x15   :  { %1190 = vmatpush3.bf16.msra.mxu1 %v1284_v19  ;;  %1163 = vmatprep.subr.bf16.mxu0 %v1285_v20  ;;  %v1322_v3 = vld [vmem:[%s1702_s1 + $0x1d0] sm:$0xff]   ;;  %v1326_v7 = vld [vmem:[%s1702_s1 + $0x1c8] sm:$0xff]   ;;  %v1329_v10 = vld [vmem:[%s1702_s1 + $0x140] sm:$0xff]  }
  0x16   :  { %1191 = vmatprep.subr.bf16.mxu1 %v1286_v21  ;;  %v1323_v4 = vld [vmem:[%s1702_s1 + $0x110] sm:$0xff]   ;;  %v1327_v8 = vld [vmem:[%s1702_s1 + $0x108] sm:$0xff]   ;;  %v1330_v11 = vld [vmem:[%s1702_s1 + $0x1c0] sm:$0xff]  }
  0x17   :  { %v1324_v5 = vld [vmem:[%s1702_s1 + $0x190] sm:$0xff]   ;;  %v1328_v9 = vld [vmem:[%s1702_s1 + $0x188] sm:$0xff]   ;;  %v1331_v12 = vld [vmem:[%s1702_s1 + $0x100] sm:$0xff]  }
  0x18   :  { %1164 = vmatpush3.bf16.msra.mxu0 %v1287_v22  ;;  %v1332_v13 = vld [vmem:[%s1702_s1 + $0x180] sm:$0xff]   ;;  %v28_v14 = vld [vmem:[%s1703_s0 + $0x10] sm:$0xff]  ;;  %v29_v16 = vld [vmem:[%s1703_s0 + $0x18] sm:$0xff] }
  0x19   :  { %1192 = vmatpush3.bf16.msra.mxu1 %v1288_v23  ;;  %1165 = vmatprep.subr.bf16.mxu0 %v1289_v24  ;;  %v32_v15 = vld [vmem:[%s1703_s0 + $0x30] sm:$0xff]  ;;  %v33_v19 = vld [vmem:[%s1703_s0 + $0x38] sm:$0xff] }
  0x1a   :  { %1193 = vmatprep.subr.bf16.mxu1 %v1290_v25  ;;  %v1058_v17 = vcombine.low %v28_v14, %v32_v15  ;;  %v1059_v18 = vcombine.high %v28_v14, %v32_v15  ;;  %v36_v20 = vld [vmem:[%s1703_s0 + $0x50] sm:$0x11]  ;;  %v37_v21 = vld [vmem:[%s1703_s0 + $0x58] sm:$0x11]  ;;  %v1060_v22 = vcombine.low %v29_v16, %v33_v19  ;;  %v1061_v23 = vcombine.high %v29_v16, %v33_v19 }
  0x1b   :  { %v1067_v24 = vcombine.high %v36_v20, %v36_v20  ;;  %v1069_v25 = vcombine.high %v37_v21, %v37_v21 }
  0x1c   :  { %1166 = vmatpush3.bf16.msra.mxu0 %v1291_v26  ;;  %v1066_v26 = vcombine.low %v36_v20, %v36_v20 }
  0x1d   :  { %1194 = vmatpush3.bf16.msra.mxu1 %v1292_v27  ;;  %1167 = vmatprep.subr.bf16.mxu0 %v1293_v28  ;;  %v1068_v27 = vcombine.low %v37_v21, %v37_v21 }
  0x1e   :  { %1195 = vmatprep.subr.bf16.mxu1 %v1294_v29 }
  0x20   :  { %1168 = vmatpush3.bf16.msra.mxu0 %v1295_v30 }
  0x21   :  { %1196 = vmatpush3.bf16.msra.mxu1 %v1296_v31  ;;  %1209 = vmatprep.subr.bf16.mxu0 %v1297_v40 }
  0x22   :  { %1237 = vmatprep.subr.bf16.mxu1 %v1298_v41 }
  0x23   :  { %651 = vmatmul.mubr.bf16.vlgmr.msra.gmra.mxu0 %v1054_v35 }
  0x24   :  { %699 = vmatmul.mubr.bf16.vlgmr.msra.gmra.mxu1 %v1056_v38  ;;  %1210 = vmatpush3.bf16.msra.mxu0 %v1299_v42 }
  0x25   :  { %1238 = vmatpush3.bf16.msra.mxu1 %v1300_v43  ;;  %1211 = vmatprep.subr.bf16.mxu0 %v1301_v44 }
  0x26   :  { %1239 = vmatprep.subr.bf16.mxu1 %v1302_v45  ;;  %658 = vmatprep.mubr.bf16.mxu0 %v1063_v59 }
  0x27   :  { %706 = vmatprep.mubr.bf16.mxu1 %v1065_v0 }
  0x28   :  { %1212 = vmatpush3.bf16.msra.mxu0 %v1303_v46 }
  0x29   :  { %1240 = vmatpush3.bf16.msra.mxu1 %v1304_v47  ;;  %1213 = vmatprep.subr.bf16.mxu0 %v1305_v48 }
  0x2a   :  { %1241 = vmatprep.subr.bf16.mxu1 %v1306_v49 }
  0x2b   :  { %659 = vmatmul.mubr.bf16.gmra.mxu0 %v1062_v61 }
  0x2c   :  { %1214 = vmatpush3.bf16.msra.mxu0 %v1307_v50  ;;  %707 = vmatmul.mubr.bf16.gmra.mxu1 %v1064_v1 }
  0x2d   :  { %1242 = vmatpush3.bf16.msra.mxu1 %v1308_v51  ;;  %1215 = vmatprep.subr.bf16.mxu0 %v1309_v52 }
  0x2e   :  { %1243 = vmatprep.subr.bf16.mxu1 %v1310_v53  ;;  %746 = vmatprep.mubr.bf16.mxu0 %v1059_v18 }
  0x2f   :  { %794 = vmatprep.mubr.bf16.mxu1 %v1061_v23 }
  0x30   :  { %1216 = vmatpush3.bf16.msra.mxu0 %v1311_v54 }
  0x31   :  { %1244 = vmatpush3.bf16.msra.mxu1 %v1312_v55  ;;  %1217 = vmatprep.subr.bf16.mxu0 %v1313_v56 }
  0x32   :  { %1245 = vmatprep.subr.bf16.mxu1 %v1314_v57 }
  0x34   :  { %1218 = vmatpush3.bf16.msra.mxu0 %v1316_v60 }
  0x35   :  { %1246 = vmatpush3.bf16.msra.mxu1 %v1317_v62  ;;  %1219 = vmatprep.subr.bf16.mxu0 %v1321_v2 }
  0x36   :  { %1247 = vmatprep.subr.bf16.mxu1 %v1322_v3 }
  0x38   :  { %1220 = vmatpush3.bf16.msra.mxu0 %v1323_v4 }
  0x39   :  { %1248 = vmatpush3.bf16.msra.mxu1 %v1324_v5  ;;  %1221 = vmatprep.subr.bf16.mxu0 %v1325_v6 }
  0x3a   :  { %1249 = vmatprep.subr.bf16.mxu1 %v1326_v7 }
  0x3c   :  { %1222 = vmatpush3.bf16.msra.mxu0 %v1327_v8 }
  0x3d   :  { %1250 = vmatpush3.bf16.msra.mxu1 %v1328_v9  ;;  %1223 = vmatprep.subr.bf16.mxu0 %v1329_v10 }
  0x3e   :  { %1251 = vmatprep.subr.bf16.mxu1 %v1330_v11 }
  0x40   :  { %1224 = vmatpush3.bf16.msra.mxu0 %v1331_v12 }
  0x41   :  { %1252 = vmatpush3.bf16.msra.mxu1 %v1332_v13 }
  0x43   :  { %747 = vmatmul.mubr.bf16.vlgmr.msra.gmra.mxu0 %v1058_v17 }
  0x44   :  { %795 = vmatmul.mubr.bf16.vlgmr.msra.gmra.mxu1 %v1060_v22  ;;  %754 = vmatprep.mubr.bf16.mxu0 %v1067_v24 }
  0x45   :  { %802 = vmatprep.mubr.bf16.mxu1 %v1069_v25 }
  0x4b   :  { %755 = vmatmul.mubr.bf16.gmra.mxu0 %v1066_v26 }
  0x4c   :  { %803 = vmatmul.mubr.bf16.gmra.mxu1 %v1068_v27 }
  0xe3   :  { %v1169_v28 = vpop.f32.mrf.mxu0 }
  0xe4   :  { %v1197_v29 = vpop.f32.mrf.mxu1 }
  0xe5   :  { %v1170_v30 = vpop.f32.mrf.mxu0 }
  0xe6   :  { %v1198_v31 = vpop.f32.mrf.mxu1  ;;  %v1171_v51 = vadd.f32 %v1170_v30, %v1169_v28 }
  0xe7   :  { %v1172_v32 = vpop.f32.mrf.mxu0  ;;  %v1199_v52 = vadd.f32 %v1198_v31, %v1197_v29 }
  0xe8   :  { %v1200_v33 = vpop.f32.mrf.mxu1 }
  0xe9   :  { %v1173_v35 = vpop.f32.mrf.mxu0  ;;  %v701_v62 = vadd.f32 %v1199_v52, %v1171_v51  ;;  %v1134_v52 = vld [vmem:[%s1706_s3] ss:$0 sm:$0xff] }
  0xea   :  { %v1201_v36 = vpop.f32.mrf.mxu1  ;;  %v1174_v48 = vadd.f32 %v1173_v35, %v1172_v32 }
  0xeb   :  { %v1175_v37 = vpop.f32.mrf.mxu0  ;;  %v1202_v49 = vadd.f32 %v1201_v36, %v1200_v33 }
  0xec   :  { %v1203_v39 = vpop.f32.mrf.mxu1 }
  0xed   :  { %v1176_v38 = vpop.f32.mrf.mxu0  ;;  %v704_v57 = vadd.f32 %v1202_v49, %v1174_v48 }
  0xee   :  { %v1204_v41 = vpop.f32.mrf.mxu1  ;;  %v1177_v58 = vadd.f32 %v1176_v38, %v1175_v37 }
  0xef   :  { %v1178_v40 = vpop.f32.mrf.mxu0  ;;  %v1205_v59 = vadd.f32 %v1204_v41, %v1203_v39 }
  0xf0   :  { %v1206_v43 = vpop.f32.mrf.mxu1 }
  0xf1   :  { %v1179_v42 = vpop.f32.mrf.mxu0  ;;  %v709_v5 = vadd.f32 %v1205_v59, %v1177_v58 }
  0xf2   :  { %v1207_v44 = vpop.f32.mrf.mxu1 }
 0x103   :  { %v1225_v45 = vpop.f32.mrf.mxu0 }
 0x104   :  { %v1253_v46 = vpop.f32.mrf.mxu1 }
 0x105   :  { %v1226_v47 = vpop.f32.mrf.mxu0 }
 0x106   :  { %v1254_v50 = vpop.f32.mrf.mxu1  ;;  %v1227_v55 = vadd.f32 %v1226_v47, %v1225_v45  ;;  %v843_v45 = vlaneseq  ;;  %v838_v47 = vld [vmem:[%s1705_s2] sm:$0x1] }
 0x107   :  { %v1228_v53 = vpop.f32.mrf.mxu0  ;;  %v1255_v8 = vadd.f32 %v1254_v50, %v1253_v46 }
 0x108   :  { %v1256_v54 = vpop.f32.mrf.mxu1  ;;  %v749_v2 = vadd.f32 %v1227_v55, %v701_v62  ;;  %v1615_v46 = vshrl.u32 %v843_v45, 7  ;;  %v1147_v45 = vld [vmem:[%s1707_s4 + $0x10] sm:$0xf] }
 0x109   :  { %v1229_v56 = vpop.f32.mrf.mxu0 }
 0x10a   :  { %v1230_v60 = vadd.f32 %v1229_v56, %v1228_v53  ;;  %v1257_v61 = vpop.f32.mrf.mxu1  ;;  %v797_v14 = vadd.f32 %v1255_v8, %v749_v2  ;;  %v1621_v48 = vsub.s32 0, %v1615_v46  ;;  %v889_v58 = vsub.s32 2, %v1615_v46 }
 0x10b   :  { %v1231_v63 = vpop.f32.mrf.mxu0  ;;  %v1258_v3 = vadd.f32 %v1257_v61, %v1256_v54  ;;  %v897_v61 = vsub.s32 3, %v1615_v46 }
 0x10c   :  { %v752_v0 = vadd.f32 %v1230_v60, %v704_v57  ;;  %v1259_v1 = vpop.f32.mrf.mxu1  ;;  %v1628_v57 = vsub.s32 1, %v1615_v46 }
 0x10d   :  { %v1232_v4 = vpop.f32.mrf.mxu0 }
 0x10e   :  { %v1233_v6 = vadd.f32 %v1232_v4, %v1231_v63  ;;  %v1260_v7 = vpop.f32.mrf.mxu1  ;;  %v800_v9 = vadd.f32 %v1258_v3, %v752_v0  ;;  %v870_v0 = vld [vmem:[%s1707_s4] sm:$0xf] }
 0x10f   :  { %v1234_v10 = vpop.f32.mrf.mxu0  ;;  %v1261_v12 = vadd.f32 %v1260_v7, %v1259_v1  ;;  %v1135_v1 = vld [vmem:[%s1707_s4 + $0x4] sm:$0xf]  ;;  %v1136_v7 = vld [vmem:[%s1707_s4 + $0x8] sm:$0xf] }
 0x110   :  { %v757_v11 = vadd.f32 %v1233_v6, %v709_v5  ;;  %v1262_v13 = vpop.f32.mrf.mxu1  ;;  %v810_v18 = vadd.f32 %v800_v9, %v797_v14  ;;  %v905_v5 = vsub.s32 4, %v1615_v46 }
 0x111   :  { %v1235_v15 = vpop.f32.mrf.mxu0  ;;  %v1137_v13 = vld [vmem:[%s1707_s4 + $0xc] sm:$0xf] }
 0x112   :  { %v805_v16 = vadd.f32 %v1261_v12, %v757_v11  ;;  %v1263_v17 = vpop.f32.mrf.mxu1  ;;  %v913_v11 = vsub.s32 5, %v1615_v46  ;;  %v965_v15 = vld [vmem:[%s1707_s4] sm:$0xf] }
 0x114   :  { %v812_v19 = vsel %vm811_vm0, %v805_v16, 0.0 }
 0x115   :  { %v813_v20 = vadd.f32 %v812_v19, %v810_v18 }
 0x117   :  { %v814_v21 = vrot.slane %v813_v20, 4 }
 0x119   :  { %v815_v22 = vadd.f32 %v814_v21, %v813_v20  ;;  %v1144_v20 = vld [vmem:[%s1707_s4 + $0x4] sm:$0xf]  ;;  %v1138_v21 = vld [vmem:[%s1707_s4 + $0x10] sm:$0xf] }
 0x11b   :  { %v816_v23 = vrot.slane %v815_v22, 2 }
 0x11d   :  { %v817_v24 = vadd.f32 %v816_v23, %v815_v22  ;;  %v929_v22 = vsub.s32 7, %v1615_v46 }
 0x11f   :  { %v818_v25 = vrot.slane %v817_v24, 1 }
 0x121   :  { %v819_v26 = vadd.f32 %v818_v25, %v817_v24 }
 0x123   :  { %v821_v27 = vmul.f32 0.055555556, %v819_v26 }
 0x125   :  { %v822_v28 = vsub.f32 %v797_v14, %v821_v27  ;;  %v823_v29 = vsub.f32 %v800_v9, %v821_v27  ;;  %v824_v30 = vsub.f32 %v805_v16, %v821_v27  ;;  %v921_v14 = vsub.s32 6, %v1615_v46  ;;  %v1141_v46 = vld [vmem:[%s1707_s4 + $0x1c] sm:$0xf] }
 0x127   :  { %v825_v31 = vmul.f32 %v822_v28, %v822_v28  ;;  %v826_v32 = vmul.f32 %v823_v29, %v823_v29  ;;  %v827_v33 = vmul.f32 %v824_v30, %v824_v30 }
 0x129   :  { %v828_v34 = vadd.f32 %v826_v32, %v825_v31  ;;  %v829_v35 = vsel %vm811_vm0, %v827_v33, 0.0 }
 0x12b   :  { %v830_v36 = vadd.f32 %v829_v35, %v828_v34 }
 0x12d   :  { %v831_v37 = vrot.slane %v830_v36, 4 }
 0x12f   :  { %v832_v38 = vadd.f32 %v831_v37, %v830_v36  ;;  %v1146_v37 = vld [vmem:[%s1707_s4 + $0xc] sm:$0xf] }
 0x131   :  { %v833_v39 = vrot.slane %v832_v38, 2 }
 0x133   :  { %v834_v40 = vadd.f32 %v833_v39, %v832_v38  ;;  %v1140_v38 = vld [vmem:[%s1707_s4 + $0x18] sm:$0xf] }
 0x135   :  { %v835_v41 = vrot.slane %v834_v40, 1 }
 0x137   :  { %v836_v42 = vadd.f32 %v835_v41, %v834_v40 }
 0x139   :  { %v837_v43 = vmul.f32 0.055555556, %v836_v42 }
 0x13b   :  { %v839_v44 = vadd.f32 1e-05, %v837_v43 }
 0x13d   :  { %1337 = vrsqrt.f32 %v839_v44 }
 0x14a   :  { %v1338_v49 = vpop.eup %1337 }
 0x14b   :  { %v841_v50 = vmul.f32 %v1338_v49, %v838_v47 }
 0x14d   :  { %v846_v51 = vrot.slane %v841_v50, %v1621_v48 }
 0x14f   :  { %v848_v53 = vmul.f32 %v846_v51, %v822_v28  ;;  %v849_v54 = vmul.f32 %v846_v51, %v823_v29  ;;  %v850_v62 = vmul.f32 %v846_v51, %v824_v30  ;;  %v1145_v29 = vld [vmem:[%s1707_s4 + $0x8] sm:$0xf]  ;;  %v1139_v30 = vld [vmem:[%s1707_s4 + $0x14] sm:$0xf] }
 0x151   :  { %v858_v55 = vadd.f32 %v1134_v52, %v848_v53  ;;  %v859_v56 = vadd.f32 %v1134_v52, %v849_v54  ;;  %v860_v12 = vadd.f32 %v1134_v52, %v850_v62 }
 0x153   :  { %vm861_vm1 = vcmp.gt.f32.partialorder %v858_v55, 0.0  ;;  %v864_v59 = vmul.f32 0.2, %v858_v55  ;;  %v865_v60 = vmul.f32 0.2, %v859_v56  ;;  %vm862_vm2 = vcmp.gt.f32.partialorder %v859_v56, 0.0 }
 0x154   :  { %v866_v36 = vmul.f32 0.2, %v860_v12  ;;  %vm863_vm3 = vcmp.gt.f32.partialorder %v860_v12, 0.0 }
 0x155   :  { %v867_v63 = vsel %vm861_vm1, %v858_v55, %v864_v59  ;;  %v868_v6 = vsel %vm862_vm2, %v859_v56, %v865_v60  ;;  %v1148_v55 = vld [vmem:[%s1707_s4 + $0x14] sm:$0xf]  ;;  %v1142_v56 = vld [vmem:[%s1707_s4 + $0x20] sm:$0xf] }
 0x156   :  { %v874_v2 = vrot.slane %v867_v63, %v1621_v48  ;;  %v882_v3 = vrot.slane %v867_v63, %v1628_v57  ;;  %v890_v4 = vrot.slane %v867_v63, %v889_v58  ;;  %v898_v10 = vrot.slane %v867_v63, %v897_v61 }
 0x157   :  { %v906_v18 = vrot.slane %v867_v63, %v905_v5  ;;  %v969_v19 = vrot.slane %v868_v6, %v1628_v57  ;;  %v976_v23 = vrot.slane %v868_v6, %v889_v58  ;;  %v983_v24 = vrot.slane %v868_v6, %v897_v61 }
 0x158   :  { %v875_v8 = vmul.f32 %v874_v2, %v870_v0  ;;  %v883_v9 = vmul.f32 %v1135_v1, %v882_v3  ;;  %v891_v17 = vmul.f32 %v1136_v7, %v890_v4  ;;  %v899_v26 = vmul.f32 %v1137_v13, %v898_v10  ;;  %v1151_v10 = vld [vmem:[%s1707_s4 + $0x20] sm:$0xf] }
 0x159   :  { %v914_v27 = vrot.slane %v867_v63, %v913_v11  ;;  %v970_v28 = vmul.f32 %v969_v19, %v965_v15  ;;  %v977_v31 = vmul.f32 %v1144_v20, %v976_v23  ;;  %v990_v32 = vrot.slane %v868_v6, %v905_v5  ;;  %v1150_v5 = vld [vmem:[%s1707_s4 + $0x1c] sm:$0xf] }
 0x15a   :  { %v884_v16 = vadd.f32 %v883_v9, %v875_v8  ;;  %v907_v34 = vmul.f32 %v1138_v21, %v906_v18  ;;  %v922_v35 = vrot.slane %v867_v63, %v921_v14  ;;  %v984_v40 = vmul.f32 %v1145_v29, %v983_v24 }
 0x15b   :  { %v978_v39 = vadd.f32 %v977_v31, %v970_v28  ;;  %v997_v41 = vrot.slane %v868_v6, %v913_v11  ;;  %v915_v43 = vmul.f32 %v1139_v30, %v914_v27  ;;  %v930_v44 = vrot.slane %v867_v63, %v929_v22  ;;  %v1149_v63 = vld [vmem:[%s1707_s4 + $0x18] sm:$0xf] }
 0x15c   :  { %v892_v25 = vadd.f32 %v891_v17, %v884_v16  ;;  %v991_v49 = vmul.f32 %v1146_v37, %v990_v32  ;;  %v1004_v50 = vrot.slane %v868_v6, %v921_v14  ;;  %v923_v52 = vmul.f32 %v1140_v38, %v922_v35  ;;  %v1143_v17 = vld [vmem:[#allocation2] ss:$0 sm:$0xff] }
 0x15d   :  { %v985_v47 = vadd.f32 %v984_v40, %v978_v39  ;;  %v938_v53 = vrot.slane %v868_v6, %v1621_v48  ;;  %v869_v54 = vsel %vm863_vm3, %v860_v12, %v866_v36  ;;  %v998_v59 = vmul.f32 %v1147_v45, %v997_v41 }
 0x15e   :  { %v900_v33 = vadd.f32 %v899_v26, %v892_v25  ;;  %v1011_v60 = vrot.slane %v868_v6, %v929_v22  ;;  %v931_v62 = vmul.f32 %v1141_v46, %v930_v44  ;;  %v1005_v1 = vmul.f32 %v1148_v55, %v1004_v50 }
 0x15f   :  { %v992_v58 = vadd.f32 %v991_v49, %v985_v47  ;;  %v1018_v2 = vrot.slane %v869_v54, %v1621_v48  ;;  %v939_v4 = vmul.f32 %v1142_v56, %v938_v53  ;;  %v1025_v6 = vrot.slane %v869_v54, %v1628_v57 }
 0x160   :  { %v908_v42 = vadd.f32 %v907_v34, %v900_v33  ;;  %v1012_v8 = vmul.f32 %v1149_v63, %v1011_v60 }
 0x161   :  { %v999_v0 = vadd.f32 %v998_v59, %v992_v58  ;;  %v1019_v12 = vmul.f32 %v1150_v5, %v1018_v2  ;;  %v1026_v14 = vmul.f32 %v1151_v10, %v1025_v6 }
 0x162   :  { %v916_v51 = vadd.f32 %v915_v43, %v908_v42 }
 0x163   :  { %v1006_v7 = vadd.f32 %v1005_v1, %v999_v0 }
 0x164   :  { %v924_v61 = vadd.f32 %v923_v52, %v916_v51 }
 0x165   :  { %v1013_v11 = vadd.f32 %v1012_v8, %v1006_v7 }
 0x166   :  { %v932_v3 = vadd.f32 %v931_v62, %v924_v61 }
 0x167   :  { %v1020_v48 = vadd.f32 %v1019_v12, %v1013_v11 }
 0x168   :  { %v940_v9 = vadd.f32 %v939_v4, %v932_v3 }
 0x169   :  { %v1027_v15 = vadd.f32 %v1026_v14, %v1020_v48 }
 0x16a   :  { %v942_v13 = vsel %vm941_vm4, %v940_v9, 0.0 }
 0x16b   :  { %943 = vadd.xlane.f32.xlu0 %v942_v13  ;;  %v1028_v16 = vsel %vm941_vm4, %v1027_v15, 0.0 }
 0x16f   :  { %1029 = vadd.xlane.f32.xlu0 %v1028_v16 }
 0x1f4   :  { %v944_v18 = vpop.xlane.xlu0 %943 }
 0x1f5   :  { %v952_v19 = vadd.f32 %v1143_v17, %v944_v18 }
 0x1f7   :  { %v953_v20 = vand.u32 2147483647, %v952_v19  ;;  %vm957_vm6 = vcmp.ge.f32.partialorder %v952_v19, 0.0 }
 0x1f8   :  { %v1030_v57 = vpop.xlane.xlu0 %1029 }
 0x1f9   :  { %v954_v21 = vsub.f32 0.0, %v953_v20  ;;  %v1038_v22 = vadd.f32 %v1143_v17, %v1030_v57 }
 0x1fb   :  { %v955_v23 = vmul.f32 1.442695, %v954_v21  ;;  %v1039_v24 = vand.u32 2147483647, %v1038_v22  ;;  %vm1043_vm7 = vcmp.ge.f32.partialorder %v1038_v22, 0.0 }
 0x1fd   :  { %1339 = vpow2.f32 %v955_v23  ;;  %v1040_v25 = vsub.f32 0.0, %v1039_v24 }
 0x1ff   :  { %v1041_v26 = vmul.f32 1.442695, %v1040_v25 }
 0x201   :  { %1341 = vpow2.f32 %v1041_v26 }
 0x20a   :  { %v1340_v27 = vpop.eup %1339 }
 0x20b   :  { %v958_v28 = vadd.f32 1.0, %v1340_v27 }
 0x20d   :  { %1343 = vrcp.f32 %v958_v28 }
 0x20e   :  { %v1342_v29 = vpop.eup %1341 }
 0x20f   :  { %v1044_v30 = vadd.f32 1.0, %v1342_v29 }
 0x211   :  { %1345 = vrcp.f32 %v1044_v30 }
 0x21a   :  { %v1344_v31 = vpop.eup %1343 }
 0x21b   :  { %v961_v32 = vmul.f32 %v1344_v31, %v1340_v27 }
 0x21d   :  { %v962_v33 = vsel %vm957_vm6, %v1344_v31, %v961_v32 }
 0x21e   :  { %964 = vst.msk [vmem:[%s1708_s6] sm:$0xf] %vm963_vm5, %v962_v33  ;;  %v1346_v34 = vpop.eup %1345 }
 0x21f   :  { %v1047_v35 = vmul.f32 %v1346_v34, %v1342_v29 }
 0x221   :  { %v1048_v36 = vsel %vm1043_vm7, %v1346_v34, %v1047_v35 }
 0x222   :  { %1049 = vst.msk [vmem:[%s1708_s6 + $0x4] sm:$0xf] %vm963_vm5, %v1048_v36 }

</bundles_post_ra>
